<compile_context>
chip_gen: v5e
topology: v5e:2x2
jax: 0.10.0
libtpu: 0.0.40
codegen_flags: <defaults>
</compile_context>

<pallas_src>
import jax
import jax.numpy as jnp
import numpy as np
from jax import lax
from jax.experimental import pallas as pl
from jax.experimental.pallas import tpu as pltpu


def _acblock_conv_kernel(x0_ref, x1_ref, x2_ref, w_ref, o_ref, acc_ref):
    """One grid step: full output plane out[n, d, :, :] (flattened to (H*W, Cout)).

    x0_ref/x1_ref/x2_ref : (Hp, Wp, Cin)  padded depth slices d, d+1, d+2 of batch n
    w_ref                : (3, 3, 3*Cin, Cout)  fused weight, kw folded into K
    o_ref                : (H*W, Cout)    output plane for (n, d)
    acc_ref              : (H*W, Cout) f32 VMEM scratch accumulator
    """
    Hp, Wp, Cin = x0_ref.shape
    H = Hp - 2
    W = Wp - 2

    acc_ref[...] = jnp.zeros_like(acc_ref)

    for kd, x_ref in enumerate((x0_ref, x1_ref, x2_ref)):
        for kh in range(3):
            # One slab load per (kd, kh); the three kw-shifted views are cheap
            # static slices of the loaded value (no 27 separate dynamic loads).
            slab = x_ref[kh:kh + H, :, :]                               # (H, Wp, Cin)
            xk = jnp.concatenate(
                [slab[:, kw:kw + W, :] for kw in range(3)], axis=-1)    # (H, W, 3*Cin)
            acc_ref[...] += jnp.dot(
                xk.reshape(H * W, 3 * Cin), w_ref[kd, kh],
                preferred_element_type=jnp.float32)

    o_ref[...] = acc_ref[...].astype(o_ref.dtype)


def _fuse_acblock_weights(w_sq, w_ver, w_hor, w_hei):
    """Fuse the four branch weights (PyTorch OIDHW layout) into one
    (kD, kH, kW, Cin, Cout) 3x3x3 weight."""
    wf = jnp.transpose(w_sq, (2, 3, 4, 1, 0))                              # (3,3,3,Ci,Co)
    # ver: kernel (3,1,3), padding (1,0,1) -> center of kH axis
    wf = wf.at[:, 1, :, :, :].add(jnp.transpose(w_ver[:, :, :, 0, :], (2, 3, 1, 0)))
    # hor: kernel (3,3,1), padding (1,1,0) -> center of kW axis
    wf = wf.at[:, :, 1, :, :].add(jnp.transpose(w_hor[:, :, :, :, 0], (2, 3, 1, 0)))
    # hei: kernel (1,3,3), padding (0,1,1) -> center of kD axis
    wf = wf.at[1, :, :, :, :].add(jnp.transpose(w_hei[:, :, 0, :, :], (2, 3, 1, 0)))
    return wf


def acblock3d_forward(x_ncdhw, w_sq, w_ver, w_hor, w_hei, compute_dtype=None):
    """ACBlock3D forward (kernel_size=3, stride=1, padding=1). Input/output NCDHW.

    compute_dtype: optionally cast activations/weights (e.g. jnp.bfloat16 on
    v6e/v7x) for MXU throughput; accumulation stays f32.
    """
    N, Cin, D, H, W = x_ncdhw.shape
    Cout = w_sq.shape[0]

    x = jnp.transpose(x_ncdhw, (0, 2, 3, 4, 1))                            # NDHWC
    # TODO(synk): the explicit jnp.pad costs one extra HBM pass; fusing the
    # halo zeros into the kernel (masked border handling) would remove it.
    x_pad = jnp.pad(x, ((0, 0), (1, 1), (1, 1), (1, 1), (0, 0)))           # (N,D+2,H+2,W+2,Ci)

    wf = _fuse_acblock_weights(w_sq, w_ver, w_hor, w_hei)                  # (3,3,3,Ci,Co)
    w2 = wf.reshape(3, 3, 3 * Cin, Cout)                                   # kw folded into K

    if compute_dtype is not None:
        x_pad = x_pad.astype(compute_dtype)
        w2 = w2.astype(compute_dtype)

    Hp, Wp = H + 2, W + 2
    itemsize = jnp.dtype(x_pad.dtype).itemsize
    cost = pl.CostEstimate(
        flops=2 * N * D * H * W * 27 * Cin * Cout,
        transcendentals=0,
        bytes_accessed=(3 * N * (D + 2) * Hp * Wp * Cin * itemsize          # 3x depth-slice reads
                        + 27 * Cin * Cout * itemsize                        # fused weight
                        + N * D * H * W * Cout * jnp.dtype(x_ncdhw.dtype).itemsize))

    out_flat = pl.pallas_call(
        _acblock_conv_kernel,
        out_shape=jax.ShapeDtypeStruct((N, D, H * W, Cout), x_ncdhw.dtype),
        grid=(N, D),
        in_specs=[
            # three padded depth slices d, d+1, d+2 of batch element n
            pl.BlockSpec((None, None, Hp, Wp, Cin), lambda n, d: (n, d, 0, 0, 0)),
            pl.BlockSpec((None, None, Hp, Wp, Cin), lambda n, d: (n, d + 1, 0, 0, 0)),
            pl.BlockSpec((None, None, Hp, Wp, Cin), lambda n, d: (n, d + 2, 0, 0, 0)),
            # fused weight, fully resident
            pl.BlockSpec((3, 3, 3 * Cin, Cout), lambda n, d: (0, 0, 0, 0)),
        ],
        out_specs=pl.BlockSpec((None, None, H * W, Cout), lambda n, d: (n, d, 0, 0)),
        scratch_shapes=[pltpu.VMEM((H * W, Cout), jnp.float32)],
        compiler_params=pltpu.CompilerParams(
            dimension_semantics=("parallel", "parallel")),
        cost_estimate=cost,
    )(x_pad, x_pad, x_pad, w2)

    out = out_flat.reshape(N, D, H, W, Cout)
    return jnp.transpose(out, (0, 4, 1, 2, 3))                             # NCDHW


def _reference_forward(x, w_sq, w_ver, w_hor, w_hei):
    """Pure-JAX reference replicating the PyTorch forward literally (4 convs)."""
    dn = ("NCDHW", "OIDHW", "NCDHW")
    sq = lax.conv_general_dilated(x, w_sq, (1, 1, 1),
                                  [(1, 1), (1, 1), (1, 1)], dimension_numbers=dn)
    ver = lax.conv_general_dilated(x, w_ver, (1, 1, 1),
                                   [(1, 1), (0, 0), (1, 1)], dimension_numbers=dn)
    hor = lax.conv_general_dilated(x, w_hor, (1, 1, 1),
                                   [(1, 1), (1, 1), (0, 0)], dimension_numbers=dn)
    hei = lax.conv_general_dilated(x, w_hei, (1, 1, 1),
                                   [(0, 0), (1, 1), (1, 1)], dimension_numbers=dn)
    return sq + ver + hor + hei


if __name__ == "__main__":
    # Small deterministic configuration: batch=2, in_channels=4, out_channels=8,
    # spatial D=H=W=8, kernel_size=3, stride=1, padding=1.
    N, Cin, Cout, D, H, W = 2, 4, 8, 8, 8, 8

    key = jax.random.PRNGKey(0)
    kx, k0, k1, k2, k3 = jax.random.split(key, 5)
    scale = 0.1
    x = jax.random.normal(kx, (N, Cin, D, H, W), jnp.float32)
    # PyTorch Conv3d weight layout: (out_channels, in_channels, kD, kH, kW)
    w_sq = scale * jax.random.normal(k0, (Cout, Cin, 3, 3, 3), jnp.float32)
    w_ver = scale * jax.random.normal(k1, (Cout, Cin, 3, 1, 3), jnp.float32)
    w_hor = scale * jax.random.normal(k2, (Cout, Cin, 3, 3, 1), jnp.float32)
    w_hei = scale * jax.random.normal(k3, (Cout, Cin, 1, 3, 3), jnp.float32)

    out = acblock3d_forward(x, w_sq, w_ver, w_hor, w_hei)
    out = jax.block_until_ready(out)

    ref = jax.block_until_ready(_reference_forward(x, w_sq, w_ver, w_hor, w_hei))

    assert out.shape == (N, Cout, D, H, W), out.shape
    max_err = float(np.max(np.abs(np.asarray(out) - np.asarray(ref))))
    assert np.allclose(np.asarray(out), np.asarray(ref), atol=2e-4, rtol=2e-4), max_err
    print("KERNEL_OK")
</pallas_src>

<mosaic_0001>
module attributes {stable_mosaic.version = 11 : i64} {
  func.func @_acblock_conv_kernel(%arg0: i32, %arg1: i32, %arg2: memref<1x1x10x10x4xf32, #tpu.memory_space<vmem>>, %arg3: memref<1x1x10x10x4xf32, #tpu.memory_space<vmem>>, %arg4: memref<1x1x10x10x4xf32, #tpu.memory_space<vmem>>, %arg5: memref<3x3x12x8xf32, #tpu.memory_space<vmem>>, %arg6: memref<1x1x64x8xf32, #tpu.memory_space<vmem>>, %arg7: memref<64x8xf32, #tpu.memory_space<vmem>>) attributes {dimension_semantics = [#tpu.dimension_semantics<parallel>, #tpu.dimension_semantics<parallel>], iteration_bounds = array<i64: 2, 8>, scalar_prefetch = 0 : i64, scratch_operands = 1 : i64, tpu.core_type = #tpu.core_type<tc>, window_params = [{transform_indices = @transform_0, window_bounds = array<i64: 1, 1, 10, 10, 4>}, {transform_indices = @transform_1, window_bounds = array<i64: 1, 1, 10, 10, 4>}, {transform_indices = @transform_2, window_bounds = array<i64: 1, 1, 10, 10, 4>}, {pipeline_mode = #tpu.pipeline_mode<synchronous>, transform_indices = @transform_3, window_bounds = array<i64: 3, 3, 12, 8>}, {transform_indices = @transform_4, window_bounds = array<i64: 1, 1, 64, 8>}]} {
    %cst = arith.constant 0.000000e+00 : f32
    %0 = vector.broadcast %cst : f32 to vector<64x8xf32>
    %c0 = arith.constant 0 : index
    %c0_0 = arith.constant 0 : index
    %1 = vector.load %arg7[%c0, %c0_0] : memref<64x8xf32, #tpu.memory_space<vmem>>, vector<64x8xf32>
    tpu.vector_store %arg7[%c0, %c0_0], %0 {strides = array<i32>} : memref<64x8xf32, #tpu.memory_space<vmem>>, vector<64x8xf32>,
    %c0_1 = arith.constant 0 : index
    %c0_2 = arith.constant 0 : index
    %c0_3 = arith.constant 0 : index
    %c0_4 = arith.constant 0 : index
    %c0_5 = arith.constant 0 : index
    %2 = vector.load %arg2[%c0_1, %c0_2, %c0_3, %c0_4, %c0_5] : memref<1x1x10x10x4xf32, #tpu.memory_space<vmem>>, vector<1x1x8x10x4xf32>
    %3 = vector.shape_cast %2 : vector<1x1x8x10x4xf32> to vector<8x10x4xf32>
    %4 = vector.extract_strided_slice %3 {offsets = [0, 0, 0], sizes = [8, 8, 4], strides = [1, 1, 1]} : vector<8x10x4xf32> to vector<8x8x4xf32>
    %5 = vector.extract_strided_slice %3 {offsets = [0, 1, 0], sizes = [8, 8, 4], strides = [1, 1, 1]} : vector<8x10x4xf32> to vector<8x8x4xf32>
    %6 = vector.extract_strided_slice %3 {offsets = [0, 2, 0], sizes = [8, 8, 4], strides = [1, 1, 1]} : vector<8x10x4xf32> to vector<8x8x4xf32>
    %7 = tpu.concatenate %4, %5, %6 in 2 : vector<8x8x4xf32>, vector<8x8x4xf32>, vector<8x8x4xf32> -> vector<8x8x12xf32>
    %c0_6 = arith.constant 0 : index
    %c0_7 = arith.constant 0 : index
    %8 = vector.load %arg7[%c0_6, %c0_7] : memref<64x8xf32, #tpu.memory_space<vmem>>, vector<64x8xf32>
    %9 = vector.shape_cast %7 : vector<8x8x12xf32> to vector<64x12xf32>
    %c0_8 = arith.constant 0 : index
    %c0_9 = arith.constant 0 : index
    %c0_10 = arith.constant 0 : index
    %c0_11 = arith.constant 0 : index
    %10 = vector.load %arg5[%c0_8, %c0_9, %c0_10, %c0_11] : memref<3x3x12x8xf32, #tpu.memory_space<vmem>>, vector<1x1x12x8xf32>
    %11 = vector.shape_cast %10 : vector<1x1x12x8xf32> to vector<12x8xf32>
    %cst_12 = arith.constant dense<0.000000e+00> : vector<64x8xf32>
    %12 = tpu.matmul %9, %11, %cst_12 {dimension_numbers = #tpu.dot_dimension_numbers<[1], [0], [0], [1], [0, 0, 1, 1], [], []>} : vector<64x12xf32>, vector<12x8xf32>, vector<64x8xf32> -> vector<64x8xf32>
    %13 = arith.addf %8, %12 : vector<64x8xf32>
    %c0_13 = arith.constant 0 : index
    %c0_14 = arith.constant 0 : index
    %14 = vector.load %arg7[%c0_13, %c0_14] : memref<64x8xf32, #tpu.memory_space<vmem>>, vector<64x8xf32>
    tpu.vector_store %arg7[%c0_13, %c0_14], %13 {strides = array<i32>} : memref<64x8xf32, #tpu.memory_space<vmem>>, vector<64x8xf32>,
    %c0_15 = arith.constant 0 : index
    %c0_16 = arith.constant 0 : index
    %c1 = arith.constant 1 : index
    %c0_17 = arith.constant 0 : index
    %c0_18 = arith.constant 0 : index
    %15 = vector.load %arg2[%c0_15, %c0_16, %c1, %c0_17, %c0_18] : memref<1x1x10x10x4xf32, #tpu.memory_space<vmem>>, vector<1x1x8x10x4xf32>
    %16 = vector.shape_cast %15 : vector<1x1x8x10x4xf32> to vector<8x10x4xf32>
    %17 = vector.extract_strided_slice %16 {offsets = [0, 0, 0], sizes = [8, 8, 4], strides = [1, 1, 1]} : vector<8x10x4xf32> to vector<8x8x4xf32>
    %18 = vector.extract_strided_slice %16 {offsets = [0, 1, 0], sizes = [8, 8, 4], strides = [1, 1, 1]} : vector<8x10x4xf32> to vector<8x8x4xf32>
    %19 = vector.extract_strided_slice %16 {offsets = [0, 2, 0], sizes = [8, 8, 4], strides = [1, 1, 1]} : vector<8x10x4xf32> to vector<8x8x4xf32>
    %20 = tpu.concatenate %17, %18, %19 in 2 : vector<8x8x4xf32>, vector<8x8x4xf32>, vector<8x8x4xf32> -> vector<8x8x12xf32>
    %c0_19 = arith.constant 0 : index
    %c0_20 = arith.constant 0 : index
    %21 = vector.load %arg7[%c0_19, %c0_20] : memref<64x8xf32, #tpu.memory_space<vmem>>, vector<64x8xf32>
    %22 = vector.shape_cast %20 : vector<8x8x12xf32> to vector<64x12xf32>
    %c0_21 = arith.constant 0 : index
    %c1_22 = arith.constant 1 : index
    %c0_23 = arith.constant 0 : index
    %c0_24 = arith.constant 0 : index
    %23 = vector.load %arg5[%c0_21, %c1_22, %c0_23, %c0_24] : memref<3x3x12x8xf32, #tpu.memory_space<vmem>>, vector<1x1x12x8xf32>
    %24 = vector.shape_cast %23 : vector<1x1x12x8xf32> to vector<12x8xf32>
    %cst_25 = arith.constant dense<0.000000e+00> : vector<64x8xf32>
    %25 = tpu.matmul %22, %24, %cst_25 {dimension_numbers = #tpu.dot_dimension_numbers<[1], [0], [0], [1], [0, 0, 1, 1], [], []>} : vector<64x12xf32>, vector<12x8xf32>, vector<64x8xf32> -> vector<64x8xf32>
    %26 = arith.addf %21, %25 : vector<64x8xf32>
    %c0_26 = arith.constant 0 : index
    %c0_27 = arith.constant 0 : index
    %27 = vector.load %arg7[%c0_26, %c0_27] : memref<64x8xf32, #tpu.memory_space<vmem>>, vector<64x8xf32>
    tpu.vector_store %arg7[%c0_26, %c0_27], %26 {strides = array<i32>} : memref<64x8xf32, #tpu.memory_space<vmem>>, vector<64x8xf32>,
    %c0_28 = arith.constant 0 : index
    %c0_29 = arith.constant 0 : index
    %c2 = arith.constant 2 : index
    %c0_30 = arith.constant 0 : index
    %c0_31 = arith.constant 0 : index
    %28 = vector.load %arg2[%c0_28, %c0_29, %c2, %c0_30, %c0_31] : memref<1x1x10x10x4xf32, #tpu.memory_space<vmem>>, vector<1x1x8x10x4xf32>
    %29 = vector.shape_cast %28 : vector<1x1x8x10x4xf32> to vector<8x10x4xf32>
    %30 = vector.extract_strided_slice %29 {offsets = [0, 0, 0], sizes = [8, 8, 4], strides = [1, 1, 1]} : vector<8x10x4xf32> to vector<8x8x4xf32>
    %31 = vector.extract_strided_slice %29 {offsets = [0, 1, 0], sizes = [8, 8, 4], strides = [1, 1, 1]} : vector<8x10x4xf32> to vector<8x8x4xf32>
    %32 = vector.extract_strided_slice %29 {offsets = [0, 2, 0], sizes = [8, 8, 4], strides = [1, 1, 1]} : vector<8x10x4xf32> to vector<8x8x4xf32>
    %33 = tpu.concatenate %30, %31, %32 in 2 : vector<8x8x4xf32>, vector<8x8x4xf32>, vector<8x8x4xf32> -> vector<8x8x12xf32>
    %c0_32 = arith.constant 0 : index
    %c0_33 = arith.constant 0 : index
    %34 = vector.load %arg7[%c0_32, %c0_33] : memref<64x8xf32, #tpu.memory_space<vmem>>, vector<64x8xf32>
    %35 = vector.shape_cast %33 : vector<8x8x12xf32> to vector<64x12xf32>
    %c0_34 = arith.constant 0 : index
    %c2_35 = arith.constant 2 : index
    %c0_36 = arith.constant 0 : index
    %c0_37 = arith.constant 0 : index
    %36 = vector.load %arg5[%c0_34, %c2_35, %c0_36, %c0_37] : memref<3x3x12x8xf32, #tpu.memory_space<vmem>>, vector<1x1x12x8xf32>
    %37 = vector.shape_cast %36 : vector<1x1x12x8xf32> to vector<12x8xf32>
    %cst_38 = arith.constant dense<0.000000e+00> : vector<64x8xf32>
    %38 = tpu.matmul %35, %37, %cst_38 {dimension_numbers = #tpu.dot_dimension_numbers<[1], [0], [0], [1], [0, 0, 1, 1], [], []>} : vector<64x12xf32>, vector<12x8xf32>, vector<64x8xf32> -> vector<64x8xf32>
    %39 = arith.addf %34, %38 : vector<64x8xf32>
    %c0_39 = arith.constant 0 : index
    %c0_40 = arith.constant 0 : index
    %40 = vector.load %arg7[%c0_39, %c0_40] : memref<64x8xf32, #tpu.memory_space<vmem>>, vector<64x8xf32>
    tpu.vector_store %arg7[%c0_39, %c0_40], %39 {strides = array<i32>} : memref<64x8xf32, #tpu.memory_space<vmem>>, vector<64x8xf32>,
    %c0_41 = arith.constant 0 : index
    %c0_42 = arith.constant 0 : index
    %c0_43 = arith.constant 0 : index
    %c0_44 = arith.constant 0 : index
    %c0_45 = arith.constant 0 : index
    %41 = vector.load %arg3[%c0_41, %c0_42, %c0_43, %c0_44, %c0_45] : memref<1x1x10x10x4xf32, #tpu.memory_space<vmem>>, vector<1x1x8x10x4xf32>
    %42 = vector.shape_cast %41 : vector<1x1x8x10x4xf32> to vector<8x10x4xf32>
    %43 = vector.extract_strided_slice %42 {offsets = [0, 0, 0], sizes = [8, 8, 4], strides = [1, 1, 1]} : vector<8x10x4xf32> to vector<8x8x4xf32>
    %44 = vector.extract_strided_slice %42 {offsets = [0, 1, 0], sizes = [8, 8, 4], strides = [1, 1, 1]} : vector<8x10x4xf32> to vector<8x8x4xf32>
    %45 = vector.extract_strided_slice %42 {offsets = [0, 2, 0], sizes = [8, 8, 4], strides = [1, 1, 1]} : vector<8x10x4xf32> to vector<8x8x4xf32>
    %46 = tpu.concatenate %43, %44, %45 in 2 : vector<8x8x4xf32>, vector<8x8x4xf32>, vector<8x8x4xf32> -> vector<8x8x12xf32>
    %c0_46 = arith.constant 0 : index
    %c0_47 = arith.constant 0 : index
    %47 = vector.load %arg7[%c0_46, %c0_47] : memref<64x8xf32, #tpu.memory_space<vmem>>, vector<64x8xf32>
    %48 = vector.shape_cast %46 : vector<8x8x12xf32> to vector<64x12xf32>
    %c1_48 = arith.constant 1 : index
    %c0_49 = arith.constant 0 : index
    %c0_50 = arith.constant 0 : index
    %c0_51 = arith.constant 0 : index
    %49 = vector.load %arg5[%c1_48, %c0_49, %c0_50, %c0_51] : memref<3x3x12x8xf32, #tpu.memory_space<vmem>>, vector<1x1x12x8xf32>
    %50 = vector.shape_cast %49 : vector<1x1x12x8xf32> to vector<12x8xf32>
    %cst_52 = arith.constant dense<0.000000e+00> : vector<64x8xf32>
    %51 = tpu.matmul %48, %50, %cst_52 {dimension_numbers = #tpu.dot_dimension_numbers<[1], [0], [0], [1], [0, 0, 1, 1], [], []>} : vector<64x12xf32>, vector<12x8xf32>, vector<64x8xf32> -> vector<64x8xf32>
    %52 = arith.addf %47, %51 : vector<64x8xf32>
    %c0_53 = arith.constant 0 : index
    %c0_54 = arith.constant 0 : index
    %53 = vector.load %arg7[%c0_53, %c0_54] : memref<64x8xf32, #tpu.memory_space<vmem>>, vector<64x8xf32>
    tpu.vector_store %arg7[%c0_53, %c0_54], %52 {strides = array<i32>} : memref<64x8xf32, #tpu.memory_space<vmem>>, vector<64x8xf32>,
    %c0_55 = arith.constant 0 : index
    %c0_56 = arith.constant 0 : index
    %c1_57 = arith.constant 1 : index
    %c0_58 = arith.constant 0 : index
    %c0_59 = arith.constant 0 : index
    %54 = vector.load %arg3[%c0_55, %c0_56, %c1_57, %c0_58, %c0_59] : memref<1x1x10x10x4xf32, #tpu.memory_space<vmem>>, vector<1x1x8x10x4xf32>
    %55 = vector.shape_cast %54 : vector<1x1x8x10x4xf32> to vector<8x10x4xf32>
    %56 = vector.extract_strided_slice %55 {offsets = [0, 0, 0], sizes = [8, 8, 4], strides = [1, 1, 1]} : vector<8x10x4xf32> to vector<8x8x4xf32>
    %57 = vector.extract_strided_slice %55 {offsets = [0, 1, 0], sizes = [8, 8, 4], strides = [1, 1, 1]} : vector<8x10x4xf32> to vector<8x8x4xf32>
    %58 = vector.extract_strided_slice %55 {offsets = [0, 2, 0], sizes = [8, 8, 4], strides = [1, 1, 1]} : vector<8x10x4xf32> to vector<8x8x4xf32>
    %59 = tpu.concatenate %56, %57, %58 in 2 : vector<8x8x4xf32>, vector<8x8x4xf32>, vector<8x8x4xf32> -> vector<8x8x12xf32>
    %c0_60 = arith.constant 0 : index
    %c0_61 = arith.constant 0 : index
    %60 = vector.load %arg7[%c0_60, %c0_61] : memref<64x8xf32, #tpu.memory_space<vmem>>, vector<64x8xf32>
    %61 = vector.shape_cast %59 : vector<8x8x12xf32> to vector<64x12xf32>
    %c1_62 = arith.constant 1 : index
    %c1_63 = arith.constant 1 : index
    %c0_64 = arith.constant 0 : index
    %c0_65 = arith.constant 0 : index
    %62 = vector.load %arg5[%c1_62, %c1_63, %c0_64, %c0_65] : memref<3x3x12x8xf32, #tpu.memory_space<vmem>>, vector<1x1x12x8xf32>
    %63 = vector.shape_cast %62 : vector<1x1x12x8xf32> to vector<12x8xf32>
    %cst_66 = arith.constant dense<0.000000e+00> : vector<64x8xf32>
    %64 = tpu.matmul %61, %63, %cst_66 {dimension_numbers = #tpu.dot_dimension_numbers<[1], [0], [0], [1], [0, 0, 1, 1], [], []>} : vector<64x12xf32>, vector<12x8xf32>, vector<64x8xf32> -> vector<64x8xf32>
    %65 = arith.addf %60, %64 : vector<64x8xf32>
    %c0_67 = arith.constant 0 : index
    %c0_68 = arith.constant 0 : index
    %66 = vector.load %arg7[%c0_67, %c0_68] : memref<64x8xf32, #tpu.memory_space<vmem>>, vector<64x8xf32>
    tpu.vector_store %arg7[%c0_67, %c0_68], %65 {strides = array<i32>} : memref<64x8xf32, #tpu.memory_space<vmem>>, vector<64x8xf32>,
    %c0_69 = arith.constant 0 : index
    %c0_70 = arith.constant 0 : index
    %c2_71 = arith.constant 2 : index
    %c0_72 = arith.constant 0 : index
    %c0_73 = arith.constant 0 : index
    %67 = vector.load %arg3[%c0_69, %c0_70, %c2_71, %c0_72, %c0_73] : memref<1x1x10x10x4xf32, #tpu.memory_space<vmem>>, vector<1x1x8x10x4xf32>
    %68 = vector.shape_cast %67 : vector<1x1x8x10x4xf32> to vector<8x10x4xf32>
    %69 = vector.extract_strided_slice %68 {offsets = [0, 0, 0], sizes = [8, 8, 4], strides = [1, 1, 1]} : vector<8x10x4xf32> to vector<8x8x4xf32>
    %70 = vector.extract_strided_slice %68 {offsets = [0, 1, 0], sizes = [8, 8, 4], strides = [1, 1, 1]} : vector<8x10x4xf32> to vector<8x8x4xf32>
    %71 = vector.extract_strided_slice %68 {offsets = [0, 2, 0], sizes = [8, 8, 4], strides = [1, 1, 1]} : vector<8x10x4xf32> to vector<8x8x4xf32>
    %72 = tpu.concatenate %69, %70, %71 in 2 : vector<8x8x4xf32>, vector<8x8x4xf32>, vector<8x8x4xf32> -> vector<8x8x12xf32>
    %c0_74 = arith.constant 0 : index
    %c0_75 = arith.constant 0 : index
    %73 = vector.load %arg7[%c0_74, %c0_75] : memref<64x8xf32, #tpu.memory_space<vmem>>, vector<64x8xf32>
    %74 = vector.shape_cast %72 : vector<8x8x12xf32> to vector<64x12xf32>
    %c1_76 = arith.constant 1 : index
    %c2_77 = arith.constant 2 : index
    %c0_78 = arith.constant 0 : index
    %c0_79 = arith.constant 0 : index
    %75 = vector.load %arg5[%c1_76, %c2_77, %c0_78, %c0_79] : memref<3x3x12x8xf32, #tpu.memory_space<vmem>>, vector<1x1x12x8xf32>
    %76 = vector.shape_cast %75 : vector<1x1x12x8xf32> to vector<12x8xf32>
    %cst_80 = arith.constant dense<0.000000e+00> : vector<64x8xf32>
    %77 = tpu.matmul %74, %76, %cst_80 {dimension_numbers = #tpu.dot_dimension_numbers<[1], [0], [0], [1], [0, 0, 1, 1], [], []>} : vector<64x12xf32>, vector<12x8xf32>, vector<64x8xf32> -> vector<64x8xf32>
    %78 = arith.addf %73, %77 : vector<64x8xf32>
    %c0_81 = arith.constant 0 : index
    %c0_82 = arith.constant 0 : index
    %79 = vector.load %arg7[%c0_81, %c0_82] : memref<64x8xf32, #tpu.memory_space<vmem>>, vector<64x8xf32>
    tpu.vector_store %arg7[%c0_81, %c0_82], %78 {strides = array<i32>} : memref<64x8xf32, #tpu.memory_space<vmem>>, vector<64x8xf32>,
    %c0_83 = arith.constant 0 : index
    %c0_84 = arith.constant 0 : index
    %c0_85 = arith.constant 0 : index
    %c0_86 = arith.constant 0 : index
    %c0_87 = arith.constant 0 : index
    %80 = vector.load %arg4[%c0_83, %c0_84, %c0_85, %c0_86, %c0_87] : memref<1x1x10x10x4xf32, #tpu.memory_space<vmem>>, vector<1x1x8x10x4xf32>
    %81 = vector.shape_cast %80 : vector<1x1x8x10x4xf32> to vector<8x10x4xf32>
    %82 = vector.extract_strided_slice %81 {offsets = [0, 0, 0], sizes = [8, 8, 4], strides = [1, 1, 1]} : vector<8x10x4xf32> to vector<8x8x4xf32>
    %83 = vector.extract_strided_slice %81 {offsets = [0, 1, 0], sizes = [8, 8, 4], strides = [1, 1, 1]} : vector<8x10x4xf32> to vector<8x8x4xf32>
    %84 = vector.extract_strided_slice %81 {offsets = [0, 2, 0], sizes = [8, 8, 4], strides = [1, 1, 1]} : vector<8x10x4xf32> to vector<8x8x4xf32>
    %85 = tpu.concatenate %82, %83, %84 in 2 : vector<8x8x4xf32>, vector<8x8x4xf32>, vector<8x8x4xf32> -> vector<8x8x12xf32>
    %c0_88 = arith.constant 0 : index
    %c0_89 = arith.constant 0 : index
    %86 = vector.load %arg7[%c0_88, %c0_89] : memref<64x8xf32, #tpu.memory_space<vmem>>, vector<64x8xf32>
    %87 = vector.shape_cast %85 : vector<8x8x12xf32> to vector<64x12xf32>
    %c2_90 = arith.constant 2 : index
    %c0_91 = arith.constant 0 : index
    %c0_92 = arith.constant 0 : index
    %c0_93 = arith.constant 0 : index
    %88 = vector.load %arg5[%c2_90, %c0_91, %c0_92, %c0_93] : memref<3x3x12x8xf32, #tpu.memory_space<vmem>>, vector<1x1x12x8xf32>
    %89 = vector.shape_cast %88 : vector<1x1x12x8xf32> to vector<12x8xf32>
    %cst_94 = arith.constant dense<0.000000e+00> : vector<64x8xf32>
    %90 = tpu.matmul %87, %89, %cst_94 {dimension_numbers = #tpu.dot_dimension_numbers<[1], [0], [0], [1], [0, 0, 1, 1], [], []>} : vector<64x12xf32>, vector<12x8xf32>, vector<64x8xf32> -> vector<64x8xf32>
    %91 = arith.addf %86, %90 : vector<64x8xf32>
    %c0_95 = arith.constant 0 : index
    %c0_96 = arith.constant 0 : index
    %92 = vector.load %arg7[%c0_95, %c0_96] : memref<64x8xf32, #tpu.memory_space<vmem>>, vector<64x8xf32>
    tpu.vector_store %arg7[%c0_95, %c0_96], %91 {strides = array<i32>} : memref<64x8xf32, #tpu.memory_space<vmem>>, vector<64x8xf32>,
    %c0_97 = arith.constant 0 : index
    %c0_98 = arith.constant 0 : index
    %c1_99 = arith.constant 1 : index
    %c0_100 = arith.constant 0 : index
    %c0_101 = arith.constant 0 : index
    %93 = vector.load %arg4[%c0_97, %c0_98, %c1_99, %c0_100, %c0_101] : memref<1x1x10x10x4xf32, #tpu.memory_space<vmem>>, vector<1x1x8x10x4xf32>
    %94 = vector.shape_cast %93 : vector<1x1x8x10x4xf32> to vector<8x10x4xf32>
    %95 = vector.extract_strided_slice %94 {offsets = [0, 0, 0], sizes = [8, 8, 4], strides = [1, 1, 1]} : vector<8x10x4xf32> to vector<8x8x4xf32>
    %96 = vector.extract_strided_slice %94 {offsets = [0, 1, 0], sizes = [8, 8, 4], strides = [1, 1, 1]} : vector<8x10x4xf32> to vector<8x8x4xf32>
    %97 = vector.extract_strided_slice %94 {offsets = [0, 2, 0], sizes = [8, 8, 4], strides = [1, 1, 1]} : vector<8x10x4xf32> to vector<8x8x4xf32>
    %98 = tpu.concatenate %95, %96, %97 in 2 : vector<8x8x4xf32>, vector<8x8x4xf32>, vector<8x8x4xf32> -> vector<8x8x12xf32>
    %c0_102 = arith.constant 0 : index
    %c0_103 = arith.constant 0 : index
    %99 = vector.load %arg7[%c0_102, %c0_103] : memref<64x8xf32, #tpu.memory_space<vmem>>, vector<64x8xf32>
    %100 = vector.shape_cast %98 : vector<8x8x12xf32> to vector<64x12xf32>
    %c2_104 = arith.constant 2 : index
    %c1_105 = arith.constant 1 : index
    %c0_106 = arith.constant 0 : index
    %c0_107 = arith.constant 0 : index
    %101 = vector.load %arg5[%c2_104, %c1_105, %c0_106, %c0_107] : memref<3x3x12x8xf32, #tpu.memory_space<vmem>>, vector<1x1x12x8xf32>
    %102 = vector.shape_cast %101 : vector<1x1x12x8xf32> to vector<12x8xf32>
    %cst_108 = arith.constant dense<0.000000e+00> : vector<64x8xf32>
    %103 = tpu.matmul %100, %102, %cst_108 {dimension_numbers = #tpu.dot_dimension_numbers<[1], [0], [0], [1], [0, 0, 1, 1], [], []>} : vector<64x12xf32>, vector<12x8xf32>, vector<64x8xf32> -> vector<64x8xf32>
    %104 = arith.addf %99, %103 : vector<64x8xf32>
    %c0_109 = arith.constant 0 : index
    %c0_110 = arith.constant 0 : index
    %105 = vector.load %arg7[%c0_109, %c0_110] : memref<64x8xf32, #tpu.memory_space<vmem>>, vector<64x8xf32>
    tpu.vector_store %arg7[%c0_109, %c0_110], %104 {strides = array<i32>} : memref<64x8xf32, #tpu.memory_space<vmem>>, vector<64x8xf32>,
    %c0_111 = arith.constant 0 : index
    %c0_112 = arith.constant 0 : index
    %c2_113 = arith.constant 2 : index
    %c0_114 = arith.constant 0 : index
    %c0_115 = arith.constant 0 : index
    %106 = vector.load %arg4[%c0_111, %c0_112, %c2_113, %c0_114, %c0_115] : memref<1x1x10x10x4xf32, #tpu.memory_space<vmem>>, vector<1x1x8x10x4xf32>
    %107 = vector.shape_cast %106 : vector<1x1x8x10x4xf32> to vector<8x10x4xf32>
    %108 = vector.extract_strided_slice %107 {offsets = [0, 0, 0], sizes = [8, 8, 4], strides = [1, 1, 1]} : vector<8x10x4xf32> to vector<8x8x4xf32>
    %109 = vector.extract_strided_slice %107 {offsets = [0, 1, 0], sizes = [8, 8, 4], strides = [1, 1, 1]} : vector<8x10x4xf32> to vector<8x8x4xf32>
    %110 = vector.extract_strided_slice %107 {offsets = [0, 2, 0], sizes = [8, 8, 4], strides = [1, 1, 1]} : vector<8x10x4xf32> to vector<8x8x4xf32>
    %111 = tpu.concatenate %108, %109, %110 in 2 : vector<8x8x4xf32>, vector<8x8x4xf32>, vector<8x8x4xf32> -> vector<8x8x12xf32>
    %c0_116 = arith.constant 0 : index
    %c0_117 = arith.constant 0 : index
    %112 = vector.load %arg7[%c0_116, %c0_117] : memref<64x8xf32, #tpu.memory_space<vmem>>, vector<64x8xf32>
    %113 = vector.shape_cast %111 : vector<8x8x12xf32> to vector<64x12xf32>
    %c2_118 = arith.constant 2 : index
    %c2_119 = arith.constant 2 : index
    %c0_120 = arith.constant 0 : index
    %c0_121 = arith.constant 0 : index
    %114 = vector.load %arg5[%c2_118, %c2_119, %c0_120, %c0_121] : memref<3x3x12x8xf32, #tpu.memory_space<vmem>>, vector<1x1x12x8xf32>
    %115 = vector.shape_cast %114 : vector<1x1x12x8xf32> to vector<12x8xf32>
    %cst_122 = arith.constant dense<0.000000e+00> : vector<64x8xf32>
    %116 = tpu.matmul %113, %115, %cst_122 {dimension_numbers = #tpu.dot_dimension_numbers<[1], [0], [0], [1], [0, 0, 1, 1], [], []>} : vector<64x12xf32>, vector<12x8xf32>, vector<64x8xf32> -> vector<64x8xf32>
    %117 = arith.addf %112, %116 : vector<64x8xf32>
    %c0_123 = arith.constant 0 : index
    %c0_124 = arith.constant 0 : index
    %118 = vector.load %arg7[%c0_123, %c0_124] : memref<64x8xf32, #tpu.memory_space<vmem>>, vector<64x8xf32>
    tpu.vector_store %arg7[%c0_123, %c0_124], %117 {strides = array<i32>} : memref<64x8xf32, #tpu.memory_space<vmem>>, vector<64x8xf32>,
    %c0_125 = arith.constant 0 : index
    %c0_126 = arith.constant 0 : index
    %119 = vector.load %arg7[%c0_125, %c0_126] : memref<64x8xf32, #tpu.memory_space<vmem>>, vector<64x8xf32>
    %c0_127 = arith.constant 0 : index
    %c0_128 = arith.constant 0 : index
    %c0_129 = arith.constant 0 : index
    %c0_130 = arith.constant 0 : index
    %120 = vector.load %arg6[%c0_127, %c0_128, %c0_129, %c0_130] : memref<1x1x64x8xf32, #tpu.memory_space<vmem>>, vector<1x1x64x8xf32>
    %121 = vector.shape_cast %120 : vector<1x1x64x8xf32> to vector<64x8xf32>
    %122 = vector.shape_cast %119 : vector<64x8xf32> to vector<1x1x64x8xf32>
    tpu.vector_store %arg6[%c0_127, %c0_128, %c0_129, %c0_130], %122 {strides = array<i32>} : memref<1x1x64x8xf32, #tpu.memory_space<vmem>>, vector<1x1x64x8xf32>,
    return
  }
  func.func @transform_0(%arg0: i32, %arg1: i32) -> (i32, i32, i32, i32, i32) {
    %c0_i32 = arith.constant 0 : i32
    %c0_i32_0 = arith.constant 0 : i32
    %c0_i32_1 = arith.constant 0 : i32
    %c0_i32_2 = arith.constant 0 : i32
    return %arg0, %arg1, %c0_i32, %c0_i32_0, %c0_i32_1 : i32, i32, i32, i32, i32
  }
  func.func @transform_1(%arg0: i32, %arg1: i32) -> (i32, i32, i32, i32, i32) {
    %c1_i32 = arith.constant 1 : i32
    %0 = arith.addi %arg1, %c1_i32 : i32
    %c0_i32 = arith.constant 0 : i32
    %c0_i32_0 = arith.constant 0 : i32
    %c0_i32_1 = arith.constant 0 : i32
    %c0_i32_2 = arith.constant 0 : i32
    return %arg0, %0, %c0_i32, %c0_i32_0, %c0_i32_1 : i32, i32, i32, i32, i32
  }
  func.func @transform_2(%arg0: i32, %arg1: i32) -> (i32, i32, i32, i32, i32) {
    %c2_i32 = arith.constant 2 : i32
    %0 = arith.addi %arg1, %c2_i32 : i32
    %c0_i32 = arith.constant 0 : i32
    %c0_i32_0 = arith.constant 0 : i32
    %c0_i32_1 = arith.constant 0 : i32
    %c0_i32_2 = arith.constant 0 : i32
    return %arg0, %0, %c0_i32, %c0_i32_0, %c0_i32_1 : i32, i32, i32, i32, i32
  }
  func.func @transform_3(%arg0: i32, %arg1: i32) -> (i32, i32, i32, i32) {
    %c0_i32 = arith.constant 0 : i32
    %c0_i32_0 = arith.constant 0 : i32
    %c0_i32_1 = arith.constant 0 : i32
    %c0_i32_2 = arith.constant 0 : i32
    %c0_i32_3 = arith.constant 0 : i32
    return %c0_i32, %c0_i32_0, %c0_i32_1, %c0_i32_2 : i32, i32, i32, i32
  }
  func.func @transform_4(%arg0: i32, %arg1: i32) -> (i32, i32, i32, i32) {
    %c0_i32 = arith.constant 0 : i32
    %c0_i32_0 = arith.constant 0 : i32
    %c0_i32_1 = arith.constant 0 : i32
    return %arg0, %arg1, %c0_i32, %c0_i32_0 : i32, i32, i32, i32
  }
}

</mosaic_0001>

<bundles_post_ra>
// kernel: tpu_custom_call.1
= control target key start
LH: loop header
LB: loop body
LE: loop exit
PB: predicated region body
PF: predicated region fallthrough
CT: control target
= control target key end

     0   :  { %s2978_s15 = smov 0   ;;  %s2980_s16 = smov 0   ;;  %s4379_s0 = inlined_call_operand.vmem [shape: f32[2,10,10,10,4], index: 0, kind: input, shape index: {}]   ;;  %s4380_s1 = inlined_call_operand.vmem [shape: f32[2,10,10,10,4], index: 1, kind: input, shape index: {}]   ;;  %s4381_s2 = inlined_call_operand.vmem [shape: f32[2,10,10,10,4], index: 2, kind: input, shape index: {}]   ;;  %s4382_s3 = inlined_call_operand.vmem [shape: f32[3,3,12,8], index: 3, kind: input, shape index: {}]   ;;  %s4383_s4 = inlined_call_operand.vmem [shape: f32[2,8,64,8], index: 4, kind: output, shape index: {}]  }
   0x1   :  { %s2982_s17 = smov 0   ;;  %s2984_s18 = smov 0  }
   0x2   :  { %s2986_s19 = smov 0  }
   0x3 LB: > { %s23_s20 = sadd.s32 1, %s2940_s17  ;;  %s26_s21 = sadd.s32 1, %s2944_s18  ;;  %s2948_s19 = sphi %s2986_s19, %s14_s19   ;;  %s2944_s18 = sphi %s2984_s18, %s4387_s18   ;;  %s2940_s17 = sphi %s2982_s17, %s4386_s17   ;;  %s2936_s16 = sphi %s2980_s16, %s4385_s16   ;;  %s2932_s15 = sphi %s2978_s15, %s4384_s15  }
   0x4   : > { %p24_p0 = scmp.ge.s32.totalorder %s23_s20, 8  ;;  %p2643_p1 = scmp.ge.s32.totalorder %s2948_s19, 1 }
   0x5   : > { %p222_p2 = scmp.lt.s32.totalorder %s2948_s19, 17 }
   0x6   : > { %s4389_s20 = smov (%p24_p0, %s23_s20), 0  ;;  %s4391_s21 = smov (!%p24_p0, %s26_s21), %s2944_s18 }
   0x7   : > { %p223_p3 = pnand %p2643_p1, %p222_p2  ;;  %p28_p4 = scmp.ge.s32.totalorder %s4391_s21, 2 }
   0x8   : > { %p276_p5 = scmp.lt.s32.totalorder (!%p223_p3), %s2936_s16, 1  ;;  %p278_p6 = scmp.lt.s32.totalorder (!%p223_p3), %s2932_s15, 9 }
   0x9   : > { %s4393_s21 = smov (%p28_p4, %s4391_s21), 0  ;;  %226 = sbr.rel (%p223_p3) target bundleno = 666 (0x29a), region = 36 }
   0xa   : > { %s2950_s30 = smov (!%p223_p3), 4   ;;  %s2951_s5 = smov (!%p223_p3), 8  }
   0xb   : > { %s285_s6 = sadd.s32 (!%p223_p3), 1, %s2932_s15  ;;  %p309_p9 = scmp.lt.s32.totalorder (!%p223_p3), %s2932_s15, 7 }
   0xc   : > { %p288_p7 = scmp.lt.s32.totalorder (!%p223_p3), %s285_s6, 9 }
   0xe   : > { %s4395_s16 = smov (!%p276_p5, %s2936_s16), 1  ;;  %vm357_vm0 = vcmask 1046528   ;;  %vm406_vm1 = vcmask 1045504   ;;  %s4397_s6 = smov (!%p288_p7, %s285_s6), 9  ;;  %vm507_vm2 = vcmask 1043456   ;;  %vm455_vm3 = vcmask 31744  }
   0xf   : > { %s279_s22 = scalar_select %p278_p6, %s2932_s15, 9  ;;  %vm316_vm4 = vcmask 64512   ;;  %vm482_vm5 = vcmask 97280  }
  0x10   : > { %s3015_s23 = smul.u32 200, %s4395_s16 }
  0x11   : > { %s2851_s24 = smul.u32 20, %s279_s22 }
  0x12   : > { %s2853_s7 = smul.u32 20, %s4397_s6  ;;  %s296_s6 = sadd.s32 2, %s2932_s15 }
  0x13   : > { %s282_s25 = sadd.s32 %s3015_s23, %s2851_s24  ;;  %p299_p8 = scmp.lt.s32.totalorder %s296_s6, 9 }
  0x14   : > { %s2644_s26 = sshll.u32 %s282_s25, 3  ;;  %s292_s10 = sadd.s32 %s2853_s7, %s3015_s23 }
  0x15   : > { %s3021_s29 = scalar_lea.vmem %s4379_s0, %s2644_s26  ;;  %s2645_s13 = sshll.u32 %s292_s10, 3 }
  0x16   : > { %v3024_v0 = vld [vmem:[%s3021_s29 + $0x40] sm:$0xff]  ;;  %v3027_v1 = vld [vmem:[%s3021_s29 + $0x48] sm:$0x3]  ;;  %v3046_v11 = vld [vmem:[%s3021_s29 + $0x50] sm:$0xff]  ;;  %s3255_s24 = scalar_lea.vmem %s4380_s1, %s2645_s13  ;;  %s4399_s6 = smov (!%p299_p8, %s296_s6), 9 }
  0x17   : > { %v3030_v2 = vld [vmem:[%s3021_s29 + $0x20] sm:$0xff]  ;;  %v3033_v3 = vrot.slane %v3024_v0, 1  ;;  %v371_v4 = vrot.slane %v3027_v1, 1  ;;  %v330_v5 = vld [vmem:[%s3021_s29 + $0x28] sm:$0x3]  ;;  %v3052_v15 = vld [vmem:[%s3021_s29 + $0x30] sm:$0xff] }
  0x18   : > { %v3038_v6 = vrot.slane %v3030_v2, 1  ;;  %v3041_v7 = vld [vmem:[%s3021_s29] sm:$0xff]  ;;  %v365_v8 = vrot.slane %v330_v5, 1  ;;  %v326_v9 = vld [vmem:[%s3021_s29 + $0x8] sm:$0x3]  ;;  %v3059_v18 = vld [vmem:[%s3021_s29 + $0x10] sm:$0xff] }
  0x19   : > { %v358_v10 = vrot.slane %v3041_v7, 1  ;;  %v372_v12 = vsel %vm357_vm0, %v3033_v3, %v371_v4  ;;  %v359_v13 = vrot.slane %v326_v9, 1  ;;  %v336_v14 = vld [vmem:[%s3021_s29 + $0x58] sm:$0x3]  ;;  %v3065_v21 = vrot.slane %v3046_v11, 1  ;;  %v3078_v30 = vld [vmem:[%s3021_s29 + $0x70] sm:$0xff] }
  0x1a   : > { %v332_v16 = vld [vmem:[%s3021_s29 + $0x38] sm:$0x3]  ;;  %390 = vrot.lane.b32.xlu2 %v372_v12, %s2950_s30  ;;  %v366_v17 = vsel %vm357_vm0, %v3038_v6, %v365_v8  ;;  %v374_v22 = vrot.slane %v336_v14, 1  ;;  %v3069_v23 = vrot.slane %v3052_v15, 1  ;;  %v361_v25 = vrot.slane %v3059_v18, 1  ;;  %v3083_v32 = vld [vmem:[%s3021_s29 + $0x60] sm:$0xff] }
  0x1b   : > { %v328_v19 = vld [vmem:[%s3021_s29 + $0x18] sm:$0x3]  ;;  %386 = vrot.lane.b32.xlu1 %v366_v17, %s2950_s30  ;;  %v360_v20 = vsel %vm357_vm0, %v358_v10, %v359_v13  ;;  %v368_v24 = vrot.slane %v332_v16, 1  ;;  %v338_v33 = vld [vmem:[%s3021_s29 + $0x68] sm:$0x3]  ;;  %v407_v34 = vrot.slane %v3041_v7, 2 }
  0x1c   : > { %382 = vrot.lane.b32.xlu0 %v360_v20, %s2950_s30  ;;  %v362_v26 = vrot.slane %v328_v19, 1  ;;  %v375_v27 = vsel %vm357_vm0, %v3065_v21, %v374_v22  ;;  %v340_v31 = vld [vmem:[%s3021_s29 + $0x78] sm:$0x3]  ;;  %v408_v35 = vrot.slane %v326_v9, 2  ;;  %v3090_v36 = vrot.slane %v3078_v30, 1  ;;  %s2854_s7 = smul.u32 20, %s4399_s6 }
  0x1d   : > { %v369_v28 = vsel %vm357_vm0, %v3069_v23, %v368_v24  ;;  %v380_v37 = vrot.slane %v340_v31, 1  ;;  %v3093_v38 = vrot.slane %v3083_v32, 1  ;;  %v377_v39 = vrot.slane %v338_v33, 1  ;;  %v2662_v60 = vld [vmem:[%s3021_s29 + $0x28] sm:$0x3]  ;;  %v3160_v24 = vld [vmem:[%s3021_s29 + $0x80] sm:$0xff] }
  0x1e   : > { %v363_v29 = vsel %vm357_vm0, %v361_v25, %v362_v26  ;;  %v409_v40 = vsel %vm406_vm1, %v407_v34, %v408_v35  ;;  %v3103_v43 = vrot.slane %v3052_v15, 2  ;;  %v417_v44 = vrot.slane %v332_v16, 2  ;;  %v2660_v62 = vld [vmem:[%s3021_s29 + $0x18] sm:$0x3]  ;;  %v2666_v13 = vld [vmem:[%s3021_s29 + $0x48] sm:$0x3]  ;;  %s303_s8 = sadd.s32 %s2854_s7, %s3015_s23 }
  0x1f   : > { %v381_v41 = vsel %vm357_vm0, %v3090_v36, %v380_v37  ;;  %v378_v42 = vsel %vm357_vm0, %v3093_v38, %v377_v39  ;;  %v3107_v45 = vrot.slane %v3030_v2, 2  ;;  %v414_v46 = vrot.slane %v330_v5, 2  ;;  %v2668_v10 = vld [vmem:[%s3021_s29 + $0x58] sm:$0x3]  ;;  %s2646_s9 = sshll.u32 %s303_s8, 3  ;;  %s4401_s15 = smov (!%p309_p9, %s2932_s15), 7 }
  0x20   : > { %v410_v47 = vrot.slane %v3059_v18, 2  ;;  %v411_v48 = vrot.slane %v328_v19, 2  ;;  %v418_v49 = vsel %vm406_vm1, %v3103_v43, %v417_v44  ;;  %v3120_v52 = vrot.slane %v3083_v32, 2  ;;  %s3521_s22 = scalar_lea.vmem %s4381_s2, %s2646_s9 }
  0x21   : > { %v415_v50 = vsel %vm406_vm1, %v3107_v45, %v414_v46  ;;  %v426_v53 = vrot.slane %v338_v33, 2  ;;  %v3124_v54 = vrot.slane %v3046_v11, 2  ;;  %v423_v55 = vrot.slane %v336_v14, 2  ;;  %v2664_v14 = vld [vmem:[%s3021_s29 + $0x38] sm:$0x3] }
  0x22   : > { %392 = vrot.lane.b32.xlu2 %v375_v27, %s2950_s30  ;;  %v412_v51 = vsel %vm406_vm1, %v410_v47, %v411_v48  ;;  %v3127_v56 = vrot.slane %v3024_v0, 2  ;;  %v420_v57 = vrot.slane %v3027_v1, 2  ;;  %v605_v63 = vrot.slane %v2662_v60, 1  ;;  %v2672_v27 = vld [vmem:[%s3021_s29 + $0x78] sm:$0x3] }
  0x23   : > { %388 = vrot.lane.b32.xlu1 %v369_v28, %s2950_s30  ;;  %v427_v58 = vsel %vm406_vm1, %v3120_v52, %v426_v53  ;;  %v424_v59 = vsel %vm406_vm1, %v3124_v54, %v423_v55  ;;  %v602_v1 = vrot.slane %v2660_v62, 1  ;;  %v3142_v4 = vrot.slane %v3078_v30, 2  ;;  %v2670_v28 = vld [vmem:[%s3021_s29 + $0x68] sm:$0x3] }
  0x24   : > { %384 = vrot.lane.b32.xlu0 %v363_v29, %s2950_s30  ;;  %v421_v61 = vsel %vm406_vm1, %v3127_v56, %v420_v57  ;;  %v429_v5 = vrot.slane %v340_v31, 2  ;;  %v606_v8 = vsel %vm357_vm0, %v3038_v6, %v605_v63  ;;  %v614_v16 = vrot.slane %v2668_v10, 1  ;;  %v2687_v57 = vld [vmem:[%s3021_s29 + $0x28] sm:$0x3] }
  0x25   : > { %v603_v9 = vsel %vm357_vm0, %v361_v25, %v602_v1  ;;  %v611_v17 = vrot.slane %v2666_v13, 1  ;;  %v608_v19 = vrot.slane %v2664_v14, 1  ;;  %v2674_v25 = vld [vmem:[%s3021_s29 + $0x88] sm:$0x3]  ;;  %v622_v29 = vrot.slane %v3160_v24, 1 }
  0x26   : > { %v430_v12 = vsel %vm406_vm1, %v3142_v4, %v429_v5  ;;  %v615_v20 = vsel %vm357_vm0, %v3065_v21, %v614_v16  ;;  %v623_v31 = vrot.slane %v2674_v25, 1  ;;  %v620_v33 = vrot.slane %v2672_v27, 1  ;;  %v3209_v1 = vld [vmem:[%s3021_s29 + $0x58] sm:$0x3]  ;;  %v480_v16 = vld [vmem:[%s4382_s3] sm:$0xff] }
  0x27   : > { %v612_v22 = vsel %vm357_vm0, %v3033_v3, %v611_v17  ;;  %v609_v26 = vsel %vm357_vm0, %v3069_v23, %v608_v19  ;;  %v617_v34 = vrot.slane %v2670_v28, 1  ;;  %v3238_v19 = vld [vmem:[%s3021_s29 + $0x78] sm:$0x3] }
  0x28   : > { %v624_v35 = vsel %vm357_vm0, %v622_v29, %v623_v31  ;;  %v621_v37 = vsel %vm357_vm0, %v3090_v36, %v620_v33  ;;  %v1049_v31 = vld [vmem:[%s3255_s24 + $0x8] sm:$0x3] }
  0x29   : > { %v618_v39 = vsel %vm357_vm0, %v3093_v38, %v617_v34  ;;  %v3269_v34 = vld [vmem:[%s3021_s29 + $0x88] sm:$0x3] }
  0x2a   : > { %431 = vrot.lane.b32.xlu2 %v409_v40, %s2951_s5  ;;  %v656_v40 = vrot.slane %v2664_v14, 2 }
  0x2b   : > { %396 = vrot.lane.b32.xlu1 %v381_v41, %s2950_s30  ;;  %v653_v41 = vrot.slane %v2662_v60, 2  ;;  %v671_v60 = vrot.slane %v2674_v25, 2  ;;  %v890_v25 = vrot.slane %v2687_v57, 2 }
  0x2c   : > { %394 = vrot.lane.b32.xlu0 %v378_v42, %s2950_s30  ;;  %v650_v42 = vrot.slane %v2660_v62, 2  ;;  %v657_v44 = vsel %vm406_vm1, %v3103_v43, %v656_v40 }
  0x2d   : > { %v654_v46 = vsel %vm406_vm1, %v3107_v45, %v653_v41  ;;  %v3281_v41 = vld [vmem:[%s3255_s24 + $0x10] sm:$0xff] }
  0x2e   : > { %v651_v48 = vsel %vm406_vm1, %v410_v47, %v650_v42  ;;  %v1051_v42 = vld [vmem:[%s3255_s24 + $0x18] sm:$0x3] }
  0x32   : > { %437 = vrot.lane.b32.xlu2 %v418_v49, %s2951_s5  ;;  %v665_v49 = vrot.slane %v2670_v28, 2  ;;  %v3262_v28 = vld [vmem:[%s3255_s24] sm:$0xff] }
  0x33   : > { %435 = vrot.lane.b32.xlu1 %v415_v50, %s2951_s5  ;;  %v662_v50 = vrot.slane %v2668_v10, 2 }
  0x34   : > { %433 = vrot.lane.b32.xlu0 %v412_v51, %s2951_s5  ;;  %v659_v51 = vrot.slane %v2666_v13, 2  ;;  %v666_v53 = vsel %vm406_vm1, %v3120_v52, %v665_v49 }
  0x35   : > { %v663_v55 = vsel %vm406_vm1, %v3124_v54, %v662_v50  ;;  %v1128_v50 = vrot.slane %v3262_v28, 2 }
  0x36   : > { %v660_v47 = vsel %vm406_vm1, %v3127_v56, %v659_v51  ;;  %v1129_v51 = vrot.slane %v1049_v31, 2 }
  0x3a   : > { %443 = vrot.lane.b32.xlu2 %v427_v58, %s2951_s5  ;;  %v842_v58 = vrot.slane %v2687_v57, 1  ;;  %v1053_v57 = vld [vmem:[%s3255_s24 + $0x28] sm:$0x3] }
  0x3b   : > { %441 = vrot.lane.b32.xlu1 %v424_v59, %s2951_s5  ;;  %v670_v59 = vrot.slane %v3160_v24, 2 }
  0x3c   : > { %439 = vrot.lane.b32.xlu0 %v421_v61, %s2951_s5  ;;  %v668_v61 = vrot.slane %v2672_v27, 2  ;;  %v843_v62 = vsel %vm357_vm0, %v3038_v6, %v842_v58  ;;  %v851_v6 = vrot.slane %v3209_v1, 1  ;;  %v891_v27 = vsel %vm406_vm1, %v3107_v45, %v890_v25 }
  0x3d   : > { %v672_v63 = vsel %vm406_vm1, %v670_v59, %v671_v60  ;;  %v1087_v60 = vrot.slane %v1053_v57, 1 }
  0x3e   : > { %v669_v5 = vsel %vm406_vm1, %v3142_v4, %v668_v61  ;;  %v852_v14 = vsel %vm357_vm0, %v3065_v21, %v851_v6  ;;  %v3244_v21 = vld [vmem:[%s3021_s29 + $0x68] sm:$0x3] }
  0x42   : > { %627 = vrot.lane.b32.xlu2 %v606_v8, %s2950_s30  ;;  %v3214_v8 = vld [vmem:[%s3021_s29 + $0x48] sm:$0x3] }
  0x43   : > { %625 = vrot.lane.b32.xlu1 %v603_v9, %s2950_s30  ;;  %v2689_v9 = vld [vmem:[%s3021_s29 + $0x38] sm:$0x3]  ;;  %v848_v10 = vrot.slane %v3214_v8, 1 }
  0x44   : > { %445 = vrot.lane.b32.xlu0 %v430_v12, %s2951_s5  ;;  %v481_v12 = vld [vmem:[%s4382_s3 + $0x8] sm:$0xf]  ;;  %v845_v13 = vrot.slane %v2689_v9, 1  ;;  %v893_v45 = vrot.slane %v2689_v9, 2 }
  0x45   : > { %2650 = vmatpush.msk.msra.mxu0 %vm507_vm2, %v481_v12  ;;  %2847 = vmatpush.msk.msra.mxu3 %vm507_vm2, %v481_v12  ;;  %v849_v17 = vsel %vm357_vm0, %v3033_v3, %v848_v10 }
  0x46   : > { %2845 = vmatpush.msk.msra.mxu1 %vm507_vm2, %v481_v12  ;;  %2846 = vmatpush.msk.msra.mxu2 %vm507_vm2, %v481_v12 }
  0x47   : > { %526 = vmatpush.msra.mxu0 %v480_v16  ;;  %2850 = vmatpush.msra.mxu3 %v480_v16 }
  0x48   : > { %2848 = vmatpush.msra.mxu1 %v480_v16  ;;  %2849 = vmatpush.msra.mxu2 %v480_v16 }
  0x4a   : > { %633 = vrot.lane.b32.xlu2 %v615_v20, %s2950_s30  ;;  %v846_v20 = vsel %vm357_vm0, %v3069_v23, %v845_v13 }
  0x4b   : > { %631 = vrot.lane.b32.xlu1 %v612_v22, %s2950_s30  ;;  %v857_v22 = vrot.slane %v3238_v19, 1 }
  0x4c   : > { %629 = vrot.lane.b32.xlu0 %v609_v26, %s2950_s30  ;;  %v854_v26 = vrot.slane %v3244_v21, 1 }
  0x4d   : > { %v858_v23 = vsel %vm357_vm0, %v3090_v36, %v857_v22  ;;  %v1081_v36 = vrot.slane %v1049_v31, 1  ;;  %v3333_v31 = vld [vmem:[%s3255_s24 + $0x30] sm:$0xff] }
  0x4e   : > { %v855_v33 = vsel %vm357_vm0, %v3093_v38, %v854_v26  ;;  %v894_v38 = vsel %vm406_vm1, %v3103_v43, %v893_v45  ;;  %v896_v43 = vrot.slane %v3214_v8, 2  ;;  %v3342_v45 = vrot.slane %v3333_v31, 1 }
  0x52   : > { %639 = vrot.lane.b32.xlu2 %v624_v35, %s2950_s30  ;;  %v1080_v35 = vrot.slane %v3262_v28, 1 }
  0x53   : > { %637 = vrot.lane.b32.xlu1 %v621_v37, %s2950_s30 }
  0x54   : > { %635 = vrot.lane.b32.xlu0 %v618_v39, %s2950_s30  ;;  %v860_v39 = vrot.slane %v3269_v34, 1  ;;  %v1082_v40 = vsel %vm357_vm0, %v1080_v35, %v1081_v36 }
  0x5a   : > { %677 = vrot.lane.b32.xlu2 %v657_v44, %s2951_s5  ;;  %v861_v44 = vsel %vm357_vm0, %v622_v29, %v860_v39  ;;  %v897_v29 = vsel %vm406_vm1, %v3127_v56, %v896_v43  ;;  %v899_v56 = vrot.slane %v3209_v1, 2  ;;  %v2725_v1 = vld [vmem:[%s3255_s24 + $0x18] sm:$0x3] }
  0x5b   : > { %675 = vrot.lane.b32.xlu1 %v654_v46, %s2951_s5  ;;  %v1083_v46 = vrot.slane %v3281_v41, 1 }
  0x5c   : > { %673 = vrot.lane.b32.xlu0 %v651_v48, %s2951_s5  ;;  %v1084_v48 = vrot.slane %v1051_v42, 1  ;;  %v900_v12 = vsel %vm406_vm1, %v3124_v54, %v899_v56  ;;  %v1135_v54 = vrot.slane %v1053_v57, 2 }
  0x62   : > { %683 = vrot.lane.b32.xlu2 %v666_v53, %s2951_s5  ;;  %v1085_v53 = vsel %vm357_vm0, %v1083_v46, %v1084_v48 }
  0x63   : > { %681 = vrot.lane.b32.xlu1 %v663_v55, %s2951_s5  ;;  %v3297_v55 = vld [vmem:[%s3255_s24 + $0x20] sm:$0xff] }
  0x64   : > { %679 = vrot.lane.b32.xlu0 %v660_v47, %s2951_s5  ;;  %v1130_v47 = vsel %vm406_vm1, %v1128_v50, %v1129_v51  ;;  %v3304_v58 = vrot.slane %v3297_v55, 1  ;;  %v3325_v16 = vrot.slane %v3297_v55, 2 }
  0x66   : > { %v1088_v6 = vsel %vm357_vm0, %v3304_v58, %v1087_v60  ;;  %v1136_v26 = vsel %vm406_vm1, %v3325_v16, %v1135_v54 }
  0x6a   : > { %865 = vrot.lane.b32.xlu2 %v843_v62, %s2950_s30 }
  0x6b   : > { %687 = vrot.lane.b32.xlu1 %v672_v63, %s2951_s5  ;;  %v1131_v63 = vrot.slane %v3281_v41, 2 }
  0x6c   : > { %685 = vrot.lane.b32.xlu0 %v669_v5, %s2951_s5  ;;  %v1132_v5 = vrot.slane %v1051_v42, 2 }
  0x6e   : > { %v1133_v13 = vsel %vm406_vm1, %v1131_v63, %v1132_v5 }
  0x72   : > { %871 = vrot.lane.b32.xlu2 %v852_v14, %s2950_s30 }
  0x73   : > { %869 = vrot.lane.b32.xlu1 %v849_v17, %s2950_s30 }
  0x74   : > { %867 = vrot.lane.b32.xlu0 %v846_v20, %s2950_s30  ;;  %v3249_v3 = vpop.permute.xlu2 %390  ;;  %v1321_v20 = vrot.slane %v2725_v1, 1 }
  0x7a   : > { %875 = vrot.lane.b32.xlu2 %v858_v23, %s2950_s30  ;;  %v2727_v23 = vld [vmem:[%s3255_s24 + $0x28] sm:$0x3] }
  0x7b   : > { %913 = vrot.lane.b32.xlu1 %v891_v27, %s2951_s5  ;;  %v1322_v27 = vsel %vm357_vm0, %v1083_v46, %v1321_v20  ;;  %v1324_v35 = vrot.slane %v2727_v23, 1  ;;  %v1372_v51 = vrot.slane %v2727_v23, 2  ;;  %v460_v20 = vsel %vm455_vm3, %v3024_v0, %v3249_v3 }
  0x7c   : > { %873 = vrot.lane.b32.xlu0 %v855_v33, %s2950_s30  ;;  %v3274_v37 = vpop.permute.xlu2 %392  ;;  %v1055_v33 = vld [vmem:[%s3255_s24 + $0x38] sm:$0x3] }
  0x7d   : > { %v1090_v39 = vrot.slane %v1055_v33, 1  ;;  %v1325_v46 = vsel %vm357_vm0, %v3304_v58, %v1324_v35  ;;  %v1138_v57 = vrot.slane %v1055_v33, 2  ;;  %v3420_v33 = vld [vmem:[%s3255_s24 + $0x50] sm:$0xff]  ;;  %v1059_v35 = vld [vmem:[%s3255_s24 + $0x58] sm:$0x3] }
  0x82   : > { %1104 = vrot.lane.b32.xlu2 %v1082_v40, %s2950_s30 }
  0x83   : > { %915 = vrot.lane.b32.xlu1 %v894_v38, %s2951_s5  ;;  %v902_v38 = vrot.slane %v3244_v21, 2  ;;  %v905_v21 = vrot.slane %v3238_v19, 2 }
  0x84   : > { %877 = vrot.lane.b32.xlu0 %v861_v44, %s2950_s30  ;;  %v432_v49 = vpop.permute.xlu2 %431 }
  0x85   : > { %v903_v43 = vsel %vm406_vm1, %v3120_v52, %v902_v38  ;;  %v3366_v52 = vrot.slane %v3333_v31, 2  ;;  %v1096_v38 = vrot.slane %v1059_v35, 1 }
  0x87   : > { %v1139_v5 = vsel %vm406_vm1, %v3366_v52, %v1138_v57 }
  0x8a   : > { %1106 = vrot.lane.b32.xlu2 %v1085_v53, %s2950_s30 }
  0x8b   : > { %917 = vrot.lane.b32.xlu1 %v897_v29, %s2951_s5 }
  0x8c   : > { %1152 = vrot.lane.b32.xlu0 %v1130_v47, %s2951_s5  ;;  %v3307_v61 = vpop.permute.xlu2 %437 }
  0x8d   : > { %v387_v62 = vpop.permute.xlu1 %386 }
  0x8e   : > { %v383_v8 = vpop.permute.xlu0 %382  ;;  %v458_v53 = vsel %vm455_vm3, %v3030_v2, %v387_v62  ;;  %v1373_v62 = vsel %vm406_vm1, %v3325_v16, %v1372_v51 }
  0x8f   : > { %v456_v9 = vsel %vm455_vm3, %v3041_v7, %v383_v8  ;;  %v1369_v7 = vrot.slane %v2725_v1, 2  ;;  %v2729_v8 = vld [vmem:[%s3255_s24 + $0x38] sm:$0x3] }
  0x90   : > { %v464_v10 = vsel %vm316_vm4, %v456_v9, %v432_v49  ;;  %v1091_v49 = vsel %vm357_vm0, %v3342_v45, %v1090_v39  ;;  %v3383_v9 = vld [vmem:[%s3255_s24 + $0x40] sm:$0xff]  ;;  %v3426_v39 = vrot.slane %v3420_v33, 1 }
  0x91   : > { %2651 = vmatmul.msk.f32.vlgmr.msra.gmra.mxu0 %vm482_vm5, %v464_v10  ;;  %v1370_v25 = vsel %vm406_vm1, %v1131_v63, %v1369_v7  ;;  %v906_v63 = vsel %vm406_vm1, %v3142_v4, %v905_v21  ;;  %v3390_v4 = vrot.slane %v3383_v9, 2  ;;  %v2676_v7 = vld [vmem:[%s4382_s3 + $0x18] sm:$0xf]  ;;  %v3399_v54 = vrot.slane %v3383_v9, 1 }
  0x92   : > { %1108 = vrot.lane.b32.xlu2 %v1088_v6, %s2950_s30  ;;  %v1057_v6 = vld [vmem:[%s3255_s24 + $0x48] sm:$0x3]  ;;  %2677 = vmatpush.msk.msrb.mxu1 %vm507_vm2, %v2676_v7 }
  0x93   : > { %919 = vrot.lane.b32.xlu1 %v900_v12, %s2951_s5  ;;  %v1141_v12 = vrot.slane %v1057_v6, 2 }
  0x94   : > { %1154 = vrot.lane.b32.xlu0 %v1133_v13, %s2951_s5  ;;  %v444_v14 = vpop.permute.xlu2 %443  ;;  %v1327_v13 = vrot.slane %v2729_v8, 1 }
  0x95   : > { %v389_v17 = vpop.permute.xlu1 %388 }
  0x96   : > { %v385_v22 = vpop.permute.xlu0 %384  ;;  %v459_v10 = vsel %vm455_vm3, %v3052_v15, %v389_v17  ;;  %v1093_v17 = vrot.slane %v1057_v6, 1  ;;  %v1328_v3 = vsel %vm357_vm0, %v3342_v45, %v1327_v13  ;;  %v3472_v6 = vld [vmem:[%s3021_s29 + $0x90] sm:$0xff]  ;;  %v1061_v13 = vld [vmem:[%s3255_s24 + $0x68] sm:$0x3] }
  0x97   : > { %v457_v47 = vsel %vm455_vm3, %v3059_v18, %v385_v22 }
  0x9a   : > { %1392 = vrot.lane.b32.xlu2 %v1370_v25, %s2951_s5  ;;  %v467_v25 = vsel %vm316_vm4, %v459_v10, %v3307_v61  ;;  %v1094_v61 = vsel %vm357_vm0, %v3399_v54, %v1093_v17  ;;  %v2701_v10 = vld [vmem:[%s3021_s29 + $0x98] sm:$0x3] }
  0x9b   : > { %1156 = vrot.lane.b32.xlu1 %v1136_v26, %s2951_s5  ;;  %v2675_v26 = vld [vmem:[%s4382_s3 + $0x10] sm:$0xff] }
  0x9c   : > { %1344 = vrot.lane.b32.xlu0 %v1322_v27, %s2950_s30  ;;  %v3339_v36 = vpop.permute.xlu2 %627  ;;  %v1142_v27 = vsel %vm406_vm1, %v3390_v4, %v1141_v12  ;;  %766 = vmatpush.msrb.mxu1 %v2675_v26  ;;  %v3476_v12 = vld [vmem:[%s3255_s24 + $0x60] sm:$0xff]  ;;  %v862_v26 = vrot.slane %v3472_v6, 1 }
  0x9d   : > { %v3344_v40 = vpop.permute.xlu1 %396  ;;  %v3482_v7 = vrot.slane %v3476_v12, 1 }
  0x9e   : > { %v395_v42 = vpop.permute.xlu0 %394 }
  0x9f   : > { %v462_v44 = vsel %vm455_vm3, %v3083_v32, %v395_v42 }
  0xa0   : > { %v470_v48 = vsel %vm316_vm4, %v462_v44, %v444_v14  ;;  %v908_v44 = vrot.slane %v3269_v34, 2 }
  0xa1   : > { %2657 = vmatmul.msk.f32.vlgmr.msra.gmra.mxu3 %vm482_vm5, %v470_v48  ;;  %v1375_v48 = vrot.slane %v2729_v8, 2 }
  0xa2   : > { %1346 = vrot.lane.b32.xlu2 %v1325_v46, %s2950_s30  ;;  %v909_v34 = vsel %vm406_vm1, %v670_v59, %v908_v44  ;;  %v3459_v59 = vrot.slane %v3420_v33, 2 }
  0xa3   : > { %1110 = vrot.lane.b32.xlu1 %v1091_v49, %s2950_s30  ;;  %v461_v49 = vsel %vm455_vm3, %v3046_v11, %v3274_v37  ;;  %v1376_v37 = vsel %vm406_vm1, %v3366_v52, %v1375_v48 }
  0xa4   : > { %921 = vrot.lane.b32.xlu0 %v903_v43, %s2951_s5  ;;  %v3361_v50 = vpop.permute.xlu2 %633  ;;  %v463_v43 = vsel %vm455_vm3, %v3078_v30, %v3344_v40  ;;  %v2731_v40 = vld [vmem:[%s3255_s24 + $0x48] sm:$0x3] }
  0xa5   : > { %v436_v29 = vpop.permute.xlu1 %435  ;;  %v1378_v57 = vrot.slane %v2731_v40, 2 }
  0xa6   : > { %v434_v19 = vpop.permute.xlu0 %433  ;;  %v466_v60 = vsel %vm316_vm4, %v458_v53, %v436_v29  ;;  %v1097_v29 = vsel %vm357_vm0, %v3426_v39, %v1096_v38  ;;  %v2733_v38 = vld [vmem:[%s3255_s24 + $0x58] sm:$0x3] }
  0xa7   : > { %v465_v56 = vsel %vm316_vm4, %v457_v47, %v434_v19  ;;  %2653 = vmatmul.msk.f32.vlgmr.msra.gmra.mxu1 %vm482_vm5, %v466_v60  ;;  %v1144_v19 = vrot.slane %v1059_v35, 2  ;;  %v1381_v44 = vrot.slane %v2733_v38, 2 }
  0xa8   : > { %2652 = vmatmul.msk.f32.gmra.mxu0 %vm482_vm5, %v465_v56  ;;  %v1330_v56 = vrot.slane %v2731_v40, 1 }
  0xaa   : > { %923 = vrot.lane.b32.xlu2 %v906_v63, %s2951_s5  ;;  %v1331_v8 = vsel %vm357_vm0, %v3399_v54, %v1330_v56  ;;  %v3532_v56 = vld [vmem:[%s3521_s22] sm:$0xff] }
  0xab   : > { %1394 = vrot.lane.b32.xlu1 %v1373_v62, %s2951_s5  ;;  %v1379_v62 = vsel %vm406_vm1, %v3390_v4, %v1378_v57  ;;  %v1382_v57 = vsel %vm406_vm1, %v3459_v59, %v1381_v44  ;;  %v1063_v44 = vld [vmem:[%s3255_s24 + $0x78] sm:$0x3] }
  0xac   : > { %1158 = vrot.lane.b32.xlu0 %v1139_v5, %s2951_s5  ;;  %v3393_v1 = vpop.permute.xlu2 %639  ;;  %v1145_v5 = vsel %vm406_vm1, %v3459_v59, %v1144_v19  ;;  %v2752_v19 = vld [vmem:[%s3255_s24 + $0x28] sm:$0x3] }
  0xad   : > { %v442_v14 = vpop.permute.xlu1 %441 }
  0xae   : > { %v440_v22 = vpop.permute.xlu0 %439  ;;  %v469_v51 = vsel %vm316_vm4, %v461_v49, %v442_v14  ;;  %v1099_v14 = vrot.slane %v1061_v13, 1  ;;  %v3505_v49 = vrot.slane %v3476_v12, 2 }
  0xaf   : > { %2654 = vmatmul.msk.f32.gmra.mxu1 %vm482_vm5, %v467_v25  ;;  %v468_v23 = vsel %vm316_vm4, %v460_v20, %v440_v22  ;;  %v910_v20 = vrot.slane %v3472_v6, 2  ;;  %v911_v22 = vrot.slane %v2701_v10, 2 }
  0xb0   : > { %2655 = vmatmul.msk.f32.vlgmr.msra.gmra.mxu2 %vm482_vm5, %v468_v23  ;;  %v863_v23 = vrot.slane %v2701_v10, 1 }
  0xb2   : > { %1160 = vrot.lane.b32.xlu2 %v1142_v27, %s2951_s5  ;;  %v864_v35 = vsel %vm357_vm0, %v862_v26, %v863_v23 }
  0xb3   : > { %1348 = vrot.lane.b32.xlu1 %v1328_v3, %s2950_s30  ;;  %v1100_v3 = vsel %vm357_vm0, %v3482_v7, %v1099_v14 }
  0xb4   : > { %1112 = vrot.lane.b32.xlu0 %v1094_v61, %s2950_s30  ;;  %v3429_v42 = vpop.permute.xlu2 %677  ;;  %v912_v61 = vsel %vm406_vm1, %v910_v20, %v911_v22  ;;  %v1561_v20 = vrot.slane %v2752_v19, 1  ;;  %v698_v22 = vsel %vm455_vm3, %v3030_v2, %v3339_v36 }
  0xb5   : > { %v3432_v46 = vpop.permute.xlu1 %625 }
  0xb6   : > { %v446_v21 = vpop.permute.xlu0 %445 }
  0xb7   : > { %v471_v53 = vsel %vm316_vm4, %v463_v43, %v446_v21  ;;  %v1147_v43 = vrot.slane %v1061_v13, 2  ;;  %v2703_v21 = vld [vmem:[%s4382_s3 + $0x28] sm:$0xf]  ;;  %v1609_v13 = vrot.slane %v2752_v19, 2 }
  0xb8   : > { %2656 = vmatmul.msk.f32.gmra.mxu2 %vm482_vm5, %v469_v51  ;;  %2658 = vmatmul.msk.f32.gmra.mxu3 %vm482_vm5, %v471_v53  ;;  %v1333_v53 = vrot.slane %v2733_v38, 1  ;;  %v3554_v38 = vld [vmem:[%s3255_s24 + $0x70] sm:$0xff] }
  0xb9   : > { %2704 = vmatpush.msk.msrb.mxu2 %vm507_vm2, %v2703_v21 }
  0xba   : > { %1114 = vrot.lane.b32.xlu2 %v1097_v29, %s2950_s30  ;;  %v697_v29 = vsel %vm455_vm3, %v3059_v18, %v3432_v46  ;;  %v1148_v18 = vsel %vm406_vm1, %v3505_v49, %v1147_v43  ;;  %v1334_v46 = vsel %vm357_vm0, %v3426_v39, %v1333_v53  ;;  %v2735_v43 = vld [vmem:[%s3255_s24 + $0x68] sm:$0x3]  ;;  %v2714_v53 = vld [vmem:[%s4382_s3 + $0x38] sm:$0xf] }
  0xbb   : > { %925 = vrot.lane.b32.xlu1 %v909_v34, %s2951_s5  ;;  %v1336_v36 = vrot.slane %v2735_v43, 1  ;;  %2715 = vmatpush.msk.msrb.mxu3 %vm507_vm2, %v2714_v53  ;;  %v2741_v53 = vld [vmem:[%s4382_s3 + $0x48] sm:$0xf] }
  0xbc   : > { %1396 = vrot.lane.b32.xlu0 %v1376_v37, %s2951_s5  ;;  %v3456_v47 = vpop.permute.xlu2 %683  ;;  %v2702_v37 = vld [vmem:[%s4382_s3 + $0x20] sm:$0xff]  ;;  %2742 = vmatpush.msk.msrb.mxu0 %vm507_vm2, %v2741_v53 }
  0xbd   : > { %v3461_v60 = vpop.permute.xlu1 %631  ;;  %1006 = vmatpush.msrb.mxu2 %v2702_v37 }
  0xbe   : > { %v3463_v63 = vpop.permute.xlu0 %629 }
  0xbf   : > { %v699_v21 = vsel %vm455_vm3, %v3052_v15, %v3463_v63 }
  0xc2   : > { %1398 = vrot.lane.b32.xlu2 %v1379_v62, %s2951_s5  ;;  %v1768_v62 = vld [vmem:[%s3521_s22 + $0x8] sm:$0x3] }
  0xc3   : > { %1162 = vrot.lane.b32.xlu1 %v1145_v5, %s2951_s5  ;;  %v1799_v5 = vrot.slane %v3532_v56, 1  ;;  %v1848_v37 = vrot.slane %v1768_v62, 2 }
  0xc4   : > { %1350 = vrot.lane.b32.xlu0 %v1331_v8, %s2950_s30  ;;  %v3485_v17 = vpop.permute.xlu2 %865  ;;  %v1800_v8 = vrot.slane %v1768_v62, 1  ;;  %v2754_v62 = vld [vmem:[%s3255_s24 + $0x38] sm:$0x3] }
  0xc5   : > { %v3488_v25 = vpop.permute.xlu1 %637 }
  0xc6   : > { %v3491_v27 = vpop.permute.xlu0 %635 }
  0xca   : > { %1116 = vrot.lane.b32.xlu2 %v1100_v3, %s2950_s30  ;;  %v1801_v3 = vsel %vm357_vm0, %v1799_v5, %v1800_v8  ;;  %v1564_v5 = vrot.slane %v2754_v62, 1  ;;  %v1384_v8 = vrot.slane %v2735_v43, 2 }
  0xcb   : > { %927 = vrot.lane.b32.xlu1 %v912_v61, %s2951_s5  ;;  %v1610_v61 = vsel %vm406_vm1, %v3325_v16, %v1609_v13  ;;  %v1102_v16 = vrot.slane %v1063_v44, 1 }
  0xcc   : > { %879 = vrot.lane.b32.xlu0 %v864_v35, %s2950_s30  ;;  %v3502_v48 = vpop.permute.xlu2 %871  ;;  %v1562_v35 = vsel %vm357_vm0, %v3304_v58, %v1561_v20  ;;  %v3567_v58 = vrot.slane %v3554_v38, 1  ;;  %v3598_v20 = vrot.slane %v3554_v38, 2  ;;  %v1385_v43 = vsel %vm406_vm1, %v3505_v49, %v1384_v8  ;;  %v2737_v8 = vld [vmem:[%s3255_s24 + $0x78] sm:$0x3] }
  0xcd   : > { %v676_v51 = vpop.permute.xlu1 %675 }
  0xce   : > { %v674_v34 = vpop.permute.xlu0 %673  ;;  %v706_v23 = vsel %vm316_vm4, %v698_v22, %v676_v51  ;;  %v1150_v22 = vrot.slane %v1063_v44, 2 }
  0xcf   : > { %v705_v40 = vsel %vm316_vm4, %v697_v29, %v674_v34  ;;  %v1847_v34 = vrot.slane %v3532_v56, 2 }
  0xd0   : > { %2678 = vmatmul.msk.f32.vlgmr.msrb.gmra.mxu1 %vm482_vm5, %v705_v40  ;;  %v2713_v40 = vld [vmem:[%s4382_s3 + $0x30] sm:$0xff]  ;;  %v1151_v44 = vsel %vm406_vm1, %v3598_v20, %v1150_v22  ;;  %v702_v22 = vsel %vm455_vm3, %v3083_v32, %v3491_v27 }
  0xd1   : > { %1245 = vmatpush.msrb.mxu3 %v2713_v40  ;;  %v1849_v19 = vsel %vm406_vm1, %v1847_v34, %v1848_v37  ;;  %v937_v34 = vsel %vm455_vm3, %v3030_v2, %v3485_v17  ;;  %v1612_v40 = vrot.slane %v2754_v62, 2  ;;  %v2740_v62 = vld [vmem:[%s4382_s3 + $0x40] sm:$0xff] }
  0xd2   : > { %1400 = vrot.lane.b32.xlu2 %v1382_v57, %s2951_s5  ;;  %v707_v57 = vsel %vm316_vm4, %v699_v21, %v3429_v42  ;;  %1485 = vmatpush.msrb.mxu0 %v2740_v62  ;;  %v1772_v62 = vld [vmem:[%s3521_s22 + $0x28] sm:$0x3] }
  0xd3   : > { %1164 = vrot.lane.b32.xlu1 %v1148_v18, %s2951_s5  ;;  %v1337_v18 = vsel %vm357_vm0, %v3482_v7, %v1336_v36  ;;  %v2952_v36 = vmov 0.0  }
  0xd4   : > { %1352 = vrot.lane.b32.xlu0 %v1334_v46, %s2950_s30  ;;  %v3539_v10 = vpop.permute.xlu2 %875  ;;  %v1103_v46 = vsel %vm357_vm0, %v3567_v58, %v1102_v16  ;;  %317 = vst.msk [vmem:[#allocation2] sm:$0xff] %vm316_vm4, %v2952_v36 }
  0xd5   : > { %v3541_v14 = vpop.permute.xlu1 %681  ;;  %318 = vst.msk [vmem:[#allocation2 + $0x8] sm:$0xff] %vm316_vm4, %v2952_v36 }
  0xd6   : > { %v680_v26 = vpop.permute.xlu0 %679  ;;  %319 = vst.msk [vmem:[#allocation2 + $0x10] sm:$0xff] %vm316_vm4, %v2952_v36 }
  0xd7   : > { %320 = vst.msk [vmem:[#allocation2 + $0x18] sm:$0xff] %vm316_vm4, %v2952_v36 }
  0xd8   : > { %2679 = vmatmul.msk.f32.gmra.mxu1 %vm482_vm5, %v706_v23  ;;  %v700_v23 = vsel %vm455_vm3, %v3024_v0, %v3461_v60  ;;  %v3614_v0 = vld [vmem:[%s3521_s22 + $0x10] sm:$0xff]  ;;  %v1770_v60 = vld [vmem:[%s3521_s22 + $0x18] sm:$0x3]  ;;  %321 = vst.msk [vmem:[#allocation2 + $0x20] sm:$0xff] %vm316_vm4, %v2952_v36 }
  0xd9   : > { %v1802_v21 = vrot.slane %v3614_v0, 1  ;;  %v1803_v16 = vrot.slane %v1770_v60, 1  ;;  %322 = vst.msk [vmem:[#allocation2 + $0x28] sm:$0xff] %vm316_vm4, %v2952_v36 }
  0xda   : > { %1823 = vrot.lane.b32.xlu2 %v1801_v3, %s2950_s30  ;;  %323 = vst.msk [vmem:[#allocation2 + $0x30] sm:$0xff] %vm316_vm4, %v2952_v36 }
  0xdb   : > { %1632 = vrot.lane.b32.xlu1 %v1610_v61, %s2951_s5  ;;  %v708_v61 = vsel %vm316_vm4, %v700_v23, %v680_v26  ;;  %324 = vst.msk [vmem:[#allocation2 + $0x38] sm:$0xff] %vm316_vm4, %v2952_v36  ;;  %v1339_v36 = vrot.slane %v2737_v8, 1 }
  0xdc   : > { %1584 = vrot.lane.b32.xlu0 %v1562_v35, %s2950_s30  ;;  %v3564_v51 = vpop.permute.xlu2 %1104  ;;  %v1565_v35 = vsel %vm357_vm0, %v3342_v45, %v1564_v5  ;;  %v1851_v45 = vrot.slane %v1770_v60, 2  ;;  %v2790_v5 = vld [vmem:[%s3521_s22 + $0x18] sm:$0x3]  ;;  %v710_v60 = vsel %vm316_vm4, %v702_v22, %v3456_v47 }
  0xdd   : > { %v3572_v29 = vpop.permute.xlu1 %687  ;;  %v1176_v47 = vsel %vm455_vm3, %v3262_v28, %v3564_v51 }
  0xde   : > { %v3576_v63 = vpop.permute.xlu0 %685 }
  0xe0   : > { %2680 = vmatmul.msk.f32.gmra.mxu1 %vm482_vm5, %v707_v57  ;;  %v2087_v57 = vrot.slane %v3614_v0, 2 }
  0xe2   : > { %1354 = vrot.lane.b32.xlu2 %v1337_v18, %s2950_s30  ;;  %v701_v18 = vsel %vm455_vm3, %v3046_v11, %v3361_v50  ;;  %v1852_v17 = vsel %vm406_vm1, %v2087_v57, %v1851_v45  ;;  %v1804_v11 = vsel %vm357_vm0, %v1802_v21, %v1803_v16  ;;  %v1613_v50 = vsel %vm406_vm1, %v3366_v52, %v1612_v40 }
  0xe3   : > { %1118 = vrot.lane.b32.xlu1 %v1103_v46, %s2950_s30  ;;  %v709_v2 = vsel %vm316_vm4, %v701_v18, %v3541_v14  ;;  %v1387_v14 = vrot.slane %v2737_v8, 2  ;;  %v2088_v40 = vrot.slane %v2790_v5, 2  ;;  %v703_v18 = vsel %vm455_vm3, %v3078_v30, %v3488_v25 }
  0xe4   : > { %1871 = vrot.lane.b32.xlu0 %v1849_v19, %s2951_s5  ;;  %v3593_v42 = vpop.permute.xlu2 %1106  ;;  %v1854_v8 = vrot.slane %v1772_v62, 2 }
  0xe5   : > { %v3595_v13 = vpop.permute.xlu1 %869  ;;  %v1388_v32 = vsel %vm406_vm1, %v3598_v20, %v1387_v14  ;;  %v2089_v25 = vsel %vm406_vm1, %v2087_v57, %v2088_v40  ;;  %v2899_v14 = vld [vmem:[%s3021_s29 + $0x50] sm:$0xff] }
  0xe6   : > { %v868_v3 = vpop.permute.xlu0 %867  ;;  %v940_v22 = vsel %vm455_vm3, %v2899_v14, %v3502_v48  ;;  %v2900_v14 = vld [vmem:[%s3021_s29 + $0x60] sm:$0xff] }
  0xe7   : > { %v938_v52 = vsel %vm455_vm3, %v3052_v15, %v868_v3  ;;  %v1340_v15 = vsel %vm357_vm0, %v3567_v58, %v1339_v36  ;;  %v2756_v3 = vld [vmem:[%s3255_s24 + $0x48] sm:$0x3] }
  0xe8   : > { %2681 = vmatmul.msk.f32.gmra.mxu1 %vm482_vm5, %v708_v61  ;;  %v2040_v61 = vrot.slane %v2790_v5, 1  ;;  %v1615_v45 = vrot.slane %v2756_v3, 2  ;;  %v1567_v53 = vrot.slane %v2756_v3, 1  ;;  %v1177_v5 = vsel %vm455_vm3, %v3281_v41, %v3593_v42  ;;  %v472_v3 = vld [vmem:[#allocation2] sm:$0xff] }
  0xe9   : > { %v704_v42 = vsel %vm455_vm3, %v3160_v24, %v3393_v1 }
  0xea   : > { %1586 = vrot.lane.b32.xlu2 %v1565_v35, %s2950_s30  ;;  %v2041_v27 = vsel %vm357_vm0, %v1802_v21, %v2040_v61  ;;  %v2898_v21 = vld [vmem:[%s3021_s29 + $0x40] sm:$0xff]  ;;  %v1568_v30 = vsel %vm357_vm0, %v3399_v54, %v1567_v53 }
  0xeb   : > { %1402 = vrot.lane.b32.xlu1 %v1385_v43, %s2951_s5 }
  0xec   : > { %1166 = vrot.lane.b32.xlu0 %v1151_v44, %s2951_s5  ;;  %v3623_v26 = vpop.permute.xlu2 %1108 }
  0xed   : > { %v914_v37 = vpop.permute.xlu1 %913 }
  0xee   : > { %v945_v46 = vsel %vm316_vm4, %v937_v34, %v914_v37  ;;  %v3640_v19 = vpop.permute.xlu0 %873  ;;  %v939_v34 = vsel %vm455_vm3, %v2898_v21, %v3595_v13  ;;  %v1616_v13 = vsel %vm406_vm1, %v3390_v4, %v1615_v45 }
  0xef   : > { %2705 = vmatmul.msk.f32.vlgmr.msrb.gmra.mxu2 %vm482_vm5, %v945_v46 }
  0xf0   : > { %2682 = vmatmul.msk.f32.gmra.mxu1 %vm482_vm5, %v709_v2  ;;  %v711_v2 = vsel %vm316_vm4, %v703_v18, %v3576_v63  ;;  %v2739_v63 = vld [vmem:[%s3255_s24 + $0x88] sm:$0x3] }
  0xf2   : > { %1873 = vrot.lane.b32.xlu2 %v1852_v17, %s2951_s5  ;;  %v3706_v17 = vld [vmem:[%s3521_s22 + $0x20] sm:$0xff] }
  0xf3   : > { %1825 = vrot.lane.b32.xlu1 %v1804_v11, %s2950_s30  ;;  %v3710_v11 = vld [vmem:[%s3255_s24 + $0x80] sm:$0xff]  ;;  %v3723_v57 = vrot.slane %v3706_v17, 2 }
  0xf4   : > { %1634 = vrot.lane.b32.xlu0 %v1613_v50, %s2951_s5  ;;  %v3662_v23 = vpop.permute.xlu2 %1392  ;;  %v1341_v4 = vrot.slane %v3710_v11, 1  ;;  %v1342_v50 = vrot.slane %v2739_v63, 1  ;;  %v1389_v45 = vrot.slane %v3710_v11, 2 }
  0xf5   : > { %v916_v35 = vpop.permute.xlu1 %915  ;;  %v1855_v24 = vsel %vm406_vm1, %v3723_v57, %v1854_v8 }
  0xf6   : > { %v3666_v43 = vpop.permute.xlu0 %877  ;;  %v946_v44 = vsel %vm316_vm4, %v938_v52, %v916_v35  ;;  %v3729_v52 = vrot.slane %v3706_v17, 1  ;;  %v1806_v35 = vrot.slane %v1772_v62, 1  ;;  %v1343_v48 = vsel %vm357_vm0, %v1341_v4, %v1342_v50 }
  0xf7   : > { %2706 = vmatmul.msk.f32.gmra.mxu2 %vm482_vm5, %v946_v44 }
  0xf8   : > { %2683 = vmatmul.msk.f32.gmra.mxu1 %vm482_vm5, %v710_v60  ;;  %v712_v60 = vsel %vm316_vm4, %v704_v42, %v3572_v29  ;;  %v1807_v1 = vsel %vm357_vm0, %v3729_v52, %v1806_v35  ;;  %v1178_v29 = vsel %vm455_vm3, %v3297_v55, %v3623_v26 }
  0xfa   : > { %1404 = vrot.lane.b32.xlu2 %v1388_v32, %s2951_s5 }
  0xfb   : > { %2063 = vrot.lane.b32.xlu1 %v2041_v27, %s2950_s30  ;;  %v2792_v27 = vld [vmem:[%s3521_s22 + $0x28] sm:$0x3] }
  0xfc   : > { %1356 = vrot.lane.b32.xlu0 %v1340_v15, %s2950_s30  ;;  %v3685_v16 = vpop.permute.xlu2 %1346  ;;  %v2091_v15 = vrot.slane %v2792_v27, 2 }
  0xfd   : > { %v918_v37 = vpop.permute.xlu1 %917 }
  0xfe   : > { %v1153_v28 = vpop.permute.xlu0 %1152  ;;  %v947_v51 = vsel %vm316_vm4, %v939_v34, %v918_v37  ;;  %v2043_v34 = vrot.slane %v2792_v27, 1 }
  0xff   : > { %v1184_v46 = vsel %vm316_vm4, %v1176_v47, %v1153_v28  ;;  %2707 = vmatmul.msk.f32.gmra.mxu2 %vm482_vm5, %v947_v51  ;;  %v1390_v47 = vrot.slane %v2739_v63, 2  ;;  %v2092_v51 = vsel %vm406_vm1, %v3723_v57, %v2091_v15 }
 0x100   : > { %2684 = vmatmul.msk.f32.gmra.mxu1 %vm482_vm5, %v711_v2  ;;  %2716 = vmatmul.msk.f32.vlgmr.msrb.gmra.mxu3 %vm482_vm5, %v1184_v46 }
 0x101   : > { %v1391_v2 = vsel %vm406_vm1, %v1389_v45, %v1390_v47 }
 0x102   : > { %1636 = vrot.lane.b32.xlu2 %v1616_v13, %s2951_s5  ;;  %v2758_v13 = vld [vmem:[%s3255_s24 + $0x58] sm:$0x3] }
 0x103   : > { %1588 = vrot.lane.b32.xlu1 %v1568_v30, %s2950_s30  ;;  %v3775_v30 = vld [vmem:[%s3521_s22 + $0x30] sm:$0xff]  ;;  %v1618_v62 = vrot.slane %v2758_v13, 2 }
 0x104   : > { %2111 = vrot.lane.b32.xlu0 %v2089_v25, %s2951_s5  ;;  %v3720_v54 = vpop.permute.xlu2 %923  ;;  %v1774_v25 = vld [vmem:[%s3521_s22 + $0x38] sm:$0x3]  ;;  %v3784_v8 = vrot.slane %v3775_v30, 1  ;;  %v3808_v27 = vrot.slane %v3775_v30, 2 }
 0x105   : > { %v920_v61 = vpop.permute.xlu1 %919 }
 0x106   : > { %v1155_v36 = vpop.permute.xlu0 %1154  ;;  %v948_v44 = vsel %vm316_vm4, %v940_v22, %v920_v61  ;;  %v941_v22 = vsel %vm455_vm3, %v2900_v14, %v3640_v19  ;;  %v1417_v19 = vsel %vm455_vm3, %v3297_v55, %v3685_v16 }
 0x107   : > { %2708 = vmatmul.msk.f32.gmra.mxu2 %vm482_vm5, %v948_v44  ;;  %v1185_v32 = vsel %vm316_vm4, %v1177_v5, %v1155_v36  ;;  %v1570_v5 = vrot.slane %v2758_v13, 1  ;;  %v1619_v36 = vsel %vm406_vm1, %v3459_v59, %v1618_v62 }
 0x108   : > { %2685 = vmatmul.msk.f32.gmra.mxu1 %vm482_vm5, %v712_v60  ;;  %2717 = vmatmul.msk.f32.gmra.mxu3 %vm482_vm5, %v1185_v32  ;;  %v2794_v60 = vld [vmem:[%s3521_s22 + $0x38] sm:$0x3]  ;;  %v2817_v32 = vld [vmem:[%s3521_s22 + $0x28] sm:$0x3] }
 0x109   : > { %v1571_v44 = vsel %vm357_vm0, %v3426_v39, %v1570_v5  ;;  %v1857_v39 = vrot.slane %v1774_v25, 2 }
 0x10a   : > { %1358 = vrot.lane.b32.xlu2 %v1343_v48, %s2950_s30  ;;  %v2280_v48 = vrot.slane %v2817_v32, 1 }
 0x10b   : > { %1875 = vrot.lane.b32.xlu1 %v1855_v24, %s2951_s5  ;;  %v2046_v24 = vrot.slane %v2794_v60, 1 }
 0x10c   : > { %1827 = vrot.lane.b32.xlu0 %v1807_v1, %s2950_s30  ;;  %v3756_v53 = vpop.permute.xlu2 %1160 }
 0x10d   : > { %v1157_v21 = vpop.permute.xlu1 %1156 }
 0x10e   : > { %v528_v37 = vpop.f32.mrf.mxu0  ;;  %v1345_v40 = vpop.permute.xlu0 %1344  ;;  %v1186_v26 = vsel %vm316_vm4, %v1178_v29, %v1157_v21  ;;  %v2901_v29 = vld [vmem:[%s3021_s29 + $0x70] sm:$0xff] }
 0x10f   : > { %v552_v18 = vadd.f32 %v528_v37, %v472_v3  ;;  %v1416_v28 = vsel %vm455_vm3, %v3281_v41, %v1345_v40  ;;  %v2044_v41 = vsel %vm357_vm0, %v3729_v52, %v2043_v34  ;;  %v942_v15 = vsel %vm455_vm3, %v2901_v29, %v3539_v10  ;;  %v478_v40 = vld [vmem:[#allocation2 + $0x30] sm:$0xff] }
 0x110   : > { %2718 = vmatmul.msk.f32.gmra.mxu3 %vm482_vm5, %v1186_v26  ;;  %v1424_v46 = vsel %vm316_vm4, %v1416_v28, %v3662_v23  ;;  %v1809_v23 = vrot.slane %v1774_v25, 1  ;;  %v950_v47 = vsel %vm316_vm4, %v942_v15, %v3720_v54  ;;  %v2281_v34 = vsel %vm357_vm0, %v3729_v52, %v2280_v48  ;;  %v474_v26 = vld [vmem:[#allocation2 + $0x10] sm:$0xff]  ;;  %v2760_v54 = vld [vmem:[%s3255_s24 + $0x68] sm:$0x3]  ;;  %v2902_v48 = vld [vmem:[%s3021_s29 + $0x80] sm:$0xff] }
 0x111   : > { %560 = vst.msk [vmem:[#allocation2] sm:$0xff] %vm316_vm4, %v552_v18  ;;  %2743 = vmatmul.msk.f32.vlgmr.msrb.gmra.mxu0 %vm482_vm5, %v1424_v46  ;;  %v2047_v10 = vsel %vm357_vm0, %v3784_v8, %v2046_v24  ;;  %v1858_v37 = vsel %vm406_vm1, %v3808_v27, %v1857_v39  ;;  %v473_v18 = vld [vmem:[#allocation2 + $0x8] sm:$0xff]  ;;  %v1573_v28 = vrot.slane %v2760_v54, 1  ;;  %v2328_v46 = vrot.slane %v2817_v32, 2 }
 0x112   : > { %2113 = vrot.lane.b32.xlu2 %v2092_v51, %s2951_s5  ;;  %v1810_v42 = vsel %vm357_vm0, %v3784_v8, %v1809_v23  ;;  %v2094_v23 = vrot.slane %v2794_v60, 2  ;;  %v943_v24 = vsel %vm455_vm3, %v2902_v48, %v3666_v43  ;;  %v1621_v29 = vrot.slane %v2760_v54, 2 }
 0x113   : > { %1406 = vrot.lane.b32.xlu1 %v1391_v2, %s2951_s5 }
 0x114   : > { %2065 = vrot.lane.b32.xlu0 %v2044_v41, %s2950_s30  ;;  %v3781_v63 = vpop.permute.xlu2 %1114 }
 0x115   : > { %v1111_v50 = vpop.permute.xlu1 %1110  ;;  %v1181_v54 = vsel %vm455_vm3, %v3420_v33, %v3781_v63 }
 0x116   : > { %v922_v61 = vpop.permute.xlu0 %921  ;;  %v1179_v55 = vsel %vm455_vm3, %v3333_v31, %v1111_v50 }
 0x117   : > { %v949_v35 = vsel %vm316_vm4, %v941_v22, %v922_v61  ;;  %v1574_v22 = vsel %vm357_vm0, %v3482_v7, %v1573_v28  ;;  %v475_v7 = vld [vmem:[#allocation2 + $0x18] sm:$0xff] }
 0x118   : > { %2709 = vmatmul.msk.f32.gmra.mxu2 %vm482_vm5, %v949_v35  ;;  %v2329_v35 = vsel %vm406_vm1, %v3723_v57, %v2328_v46 }
 0x11a   : > { %1829 = vrot.lane.b32.xlu2 %v1810_v42, %s2950_s30  ;;  %v2095_v42 = vsel %vm406_vm1, %v3808_v27, %v2094_v23 }
 0x11b   : > { %1638 = vrot.lane.b32.xlu1 %v1619_v36, %s2951_s5  ;;  %v3849_v36 = vld [vmem:[%s3521_s22 + $0x40] sm:$0xff] }
 0x11c   : > { %1590 = vrot.lane.b32.xlu0 %v1571_v44, %s2950_s30  ;;  %v3805_v1 = vpop.permute.xlu2 %1398  ;;  %v1776_v44 = vld [vmem:[%s3521_s22 + $0x48] sm:$0x3]  ;;  %v3859_v32 = vrot.slane %v3849_v36, 1 }
 0x11d   : > { %v1395_v59 = vpop.permute.xlu1 %1394  ;;  %v1860_v60 = vrot.slane %v1776_v44, 2 }
 0x11e   : > { %v1159_v16 = vpop.permute.xlu0 %1158  ;;  %v1425_v3 = vsel %vm316_vm4, %v1417_v19, %v1395_v59  ;;  %v1812_v19 = vrot.slane %v1776_v44, 1 }
 0x11f   : > { %v1187_v21 = vsel %vm316_vm4, %v1179_v55, %v1159_v16  ;;  %2744 = vmatmul.msk.f32.gmra.mxu0 %vm482_vm5, %v1425_v3 }
 0x120   : > { %2710 = vmatmul.msk.f32.gmra.mxu2 %vm482_vm5, %v950_v47  ;;  %2719 = vmatmul.msk.f32.gmra.mxu3 %vm482_vm5, %v1187_v21  ;;  %v2768_v47 = vld [vmem:[%s4382_s3 + $0x58] sm:$0xf] }
 0x121   : > { %2769 = vmatpush.msk.msra.mxu1 %vm507_vm2, %v2768_v47  ;;  %v1778_v47 = vld [vmem:[%s3521_s22 + $0x58] sm:$0x3] }
 0x122   : > { %2303 = vrot.lane.b32.xlu2 %v2281_v34, %s2950_s30  ;;  %v2767_v34 = vld [vmem:[%s4382_s3 + $0x50] sm:$0xff] }
 0x123   : > { %2067 = vrot.lane.b32.xlu1 %v2047_v10, %s2950_s30  ;;  %v476_v10 = vld [vmem:[#allocation2 + $0x20] sm:$0xff]  ;;  %1725 = vmatpush.msra.mxu1 %v2767_v34  ;;  %v1815_v34 = vrot.slane %v1778_v47, 1 }
 0x124   : > { %1877 = vrot.lane.b32.xlu0 %v1858_v37, %s2951_s5  ;;  %v546_v52 = vpop.f32.mrf.mxu3  ;;  %v534_v51 = vpop.f32.mrf.mxu1  ;;  %v1622_v37 = vsel %vm406_vm1, %v3505_v49, %v1621_v29  ;;  %v2779_v49 = vld [vmem:[%s4382_s3 + $0x68] sm:$0xf] }
 0x125   : > { %v558_v2 = vadd.f32 %v546_v52, %v478_v40  ;;  %v554_v41 = vadd.f32 %v534_v51, %v474_v26  ;;  %v531_v13 = vpop.f32.mrf.mxu0  ;;  %v1349_v25 = vpop.permute.xlu1 %1348  ;;  %v2819_v40 = vld [vmem:[%s3521_s22 + $0x38] sm:$0x3]  ;;  %v2796_v26 = vld [vmem:[%s3521_s22 + $0x48] sm:$0x3]  ;;  %2780 = vmatpush.msk.msra.mxu2 %vm507_vm2, %v2779_v49 }
 0x126   : > { %v553_v62 = vadd.f32 %v531_v13, %v473_v18  ;;  %v1113_v50 = vpop.permute.xlu0 %1112  ;;  %v3832_v5 = vpop.permute.xlu2 %1116  ;;  %v1418_v15 = vsel %vm455_vm3, %v3333_v31, %v1349_v25  ;;  %v1813_v31 = vsel %vm357_vm0, %v3859_v32, %v1812_v19  ;;  %v2097_v28 = vrot.slane %v2796_v26, 2 }
 0x127   : > { %566 = vst.msk [vmem:[#allocation2 + $0x30] sm:$0xff] %vm316_vm4, %v558_v2  ;;  %v1180_v14 = vsel %vm455_vm3, %v3383_v9, %v1113_v50  ;;  %v2283_v51 = vrot.slane %v2819_v40, 1  ;;  %v2049_v2 = vrot.slane %v2796_v26, 1  ;;  %v2331_v19 = vrot.slane %v2819_v40, 2 }
 0x128   : > { %562 = vst.msk [vmem:[#allocation2 + $0x10] sm:$0xff] %vm316_vm4, %v554_v41  ;;  %v1188_v61 = vsel %vm316_vm4, %v1180_v14, %v3756_v53  ;;  %v3855_v53 = vrot.slane %v3849_v36, 2 }
 0x129   : > { %561 = vst.msk [vmem:[#allocation2 + $0x8] sm:$0xff] %vm316_vm4, %v553_v62  ;;  %2720 = vmatmul.msk.f32.gmra.mxu3 %vm482_vm5, %v1188_v61  ;;  %v2778_v62 = vld [vmem:[%s4382_s3 + $0x60] sm:$0xff]  ;;  %v2284_v14 = vsel %vm357_vm0, %v3784_v8, %v2283_v51  ;;  %v2050_v61 = vsel %vm357_vm0, %v3859_v32, %v2049_v2 }
 0x12a   : > { %1592 = vrot.lane.b32.xlu2 %v1574_v22, %s2950_s30  ;;  %v1861_v21 = vsel %vm406_vm1, %v3855_v53, %v1860_v60  ;;  %v2098_v23 = vsel %vm406_vm1, %v3855_v53, %v2097_v28  ;;  %1964 = vmatpush.msra.mxu2 %v2778_v62  ;;  %v477_v22 = vld [vmem:[#allocation2 + $0x28] sm:$0xff] }
 0x12b   : > { %2351 = vrot.lane.b32.xlu1 %v2329_v35, %s2951_s5  ;;  %v2762_v35 = vld [vmem:[%s3255_s24 + $0x78] sm:$0x3] }
 0x12c   : > { %2115 = vrot.lane.b32.xlu0 %v2095_v42, %s2951_s5  ;;  %v537_v57 = vpop.f32.mrf.mxu1  ;;  %v1576_v8 = vrot.slane %v2762_v35, 1 }
 0x12d   : > { %v555_v59 = vadd.f32 %v537_v57, %v475_v7  ;;  %v926_v39 = vpop.permute.xlu1 %925  ;;  %v1624_v7 = vrot.slane %v2762_v35, 2  ;;  %v3986_v35 = vld [vmem:[%s3521_s22 + $0x60] sm:$0xff] }
 0x12e   : > { %v1397_v55 = vpop.permute.xlu0 %1396  ;;  %v951_v16 = vsel %vm316_vm4, %v943_v24, %v926_v39  ;;  %v3867_v3 = vpop.permute.xlu2 %1400 }
 0x12f   : > { %563 = vst.msk [vmem:[#allocation2 + $0x18] sm:$0xff] %vm316_vm4, %v555_v59  ;;  %2711 = vmatmul.msk.f32.gmra.mxu2 %vm482_vm5, %v951_v16  ;;  %v1426_v43 = vsel %vm316_vm4, %v1418_v15, %v1397_v55  ;;  %v1625_v39 = vsel %vm406_vm1, %v3598_v20, %v1624_v7  ;;  %v1577_v15 = vsel %vm357_vm0, %v3567_v58, %v1576_v8  ;;  %v3936_v16 = vld [vmem:[%s3521_s22 + $0x50] sm:$0xff] }
 0x130   : > { %2745 = vmatmul.msk.f32.gmra.mxu0 %vm482_vm5, %v1426_v43  ;;  %v2332_v55 = vsel %vm406_vm1, %v3808_v27, %v2331_v19  ;;  %v2798_v43 = vld [vmem:[%s3521_s22 + $0x58] sm:$0x3]  ;;  %v3947_v58 = vrot.slane %v3936_v16, 2  ;;  %v1863_v27 = vrot.slane %v1778_v47, 2  ;;  %v2800_v47 = vld [vmem:[%s3521_s22 + $0x68] sm:$0x3] }
 0x131   : > { %v2052_v20 = vrot.slane %v2798_v43, 1  ;;  %v2100_v51 = vrot.slane %v2798_v43, 2  ;;  %v2806_v19 = vld [vmem:[%s4382_s3 + $0x78] sm:$0xf] }
 0x132   : > { %1879 = vrot.lane.b32.xlu2 %v1861_v21, %s2951_s5  ;;  %2807 = vmatpush.msk.msra.mxu3 %vm507_vm2, %v2806_v19  ;;  %v2823_v43 = vld [vmem:[%s3521_s22 + $0x58] sm:$0x3] }
 0x133   : > { %v540_v18 = vpop.f32.mrf.mxu2  ;;  %1831 = vrot.lane.b32.xlu1 %v1813_v31, %s2950_s30  ;;  %v3950_v31 = vrot.slane %v3936_v16, 1 }
 0x134   : > { %v556_v52 = vadd.f32 %v540_v18, %v476_v10  ;;  %1640 = vrot.lane.b32.xlu0 %v1622_v37, %s2951_s5  ;;  %v1864_v18 = vsel %vm406_vm1, %v3947_v58, %v1863_v27  ;;  %v2055_v27 = vrot.slane %v2800_v47, 1 }
 0x135   : > { %v1163_v46 = vpop.permute.xlu1 %1162  ;;  %v2053_v26 = vsel %vm357_vm0, %v3950_v31, %v2052_v20  ;;  %v1816_v28 = vsel %vm357_vm0, %v3950_v31, %v1815_v34  ;;  %v2289_v20 = vrot.slane %v2823_v43, 1 }
 0x136   : > { %564 = vst.msk [vmem:[#allocation2 + $0x20] sm:$0xff] %vm316_vm4, %v556_v52  ;;  %v1351_v41 = vpop.permute.xlu0 %1350  ;;  %v1189_v63 = vsel %vm316_vm4, %v1181_v54, %v1163_v46  ;;  %v3899_v13 = vpop.permute.xlu2 %1823  ;;  %v2821_v52 = vld [vmem:[%s3521_s22 + $0x48] sm:$0x3] }
 0x137   : > { %v1419_v25 = vsel %vm455_vm3, %v3383_v9, %v1351_v41  ;;  %2721 = vmatmul.msk.f32.gmra.mxu3 %vm482_vm5, %v1189_v63  ;;  %v479_v9 = vld [vmem:[#allocation2 + $0x38] sm:$0xff]  ;;  %v2286_v49 = vrot.slane %v2821_v52, 1 }
 0x138   : > { %v1427_v50 = vsel %vm316_vm4, %v1419_v25, %v3805_v1 }
 0x139   : > { %2746 = vmatmul.msk.f32.gmra.mxu0 %vm482_vm5, %v1427_v50 }
 0x13a   : > { %2117 = vrot.lane.b32.xlu2 %v2098_v23, %s2951_s5  ;;  %v2903_v23 = vld [vmem:[%s3255_s24 + $0x20] sm:$0xff] }
 0x13b   : > { %v543_v42 = vpop.f32.mrf.mxu2  ;;  %v549_v44 = vpop.f32.mrf.mxu3  ;;  %2305 = vrot.lane.b32.xlu1 %v2284_v14, %s2950_s30 }
 0x13c   : > { %v557_v1 = vadd.f32 %v543_v42, %v477_v22  ;;  %v559_v60 = vadd.f32 %v549_v44, %v479_v9  ;;  %2069 = vrot.lane.b32.xlu0 %v2050_v61, %s2950_s30  ;;  %v2101_v22 = vsel %vm406_vm1, %v3947_v58, %v2100_v51  ;;  %v2287_v9 = vsel %vm357_vm0, %v3859_v32, %v2286_v49  ;;  %v2764_v61 = vld [vmem:[%s3255_s24 + $0x88] sm:$0x3]  ;;  %v2766_v51 = vld [vmem:[%s3255_s24 + $0x98] sm:$0x3] }
 0x13d   : > { %v928_v57 = vpop.permute.xlu1 %927  ;;  %v1780_v42 = vld [vmem:[%s3521_s22 + $0x68] sm:$0x3]  ;;  %v1895_v44 = vsel %vm455_vm3, %v3532_v56, %v3899_v13  ;;  %v1627_v7 = vrot.slane %v2764_v61, 2  ;;  %v1579_v32 = vrot.slane %v2764_v61, 1  ;;  %v2337_v49 = vrot.slane %v2823_v43, 2 }
 0x13e   : > { %565 = vst.msk [vmem:[#allocation2 + $0x28] sm:$0xff] %vm316_vm4, %v557_v1  ;;  %v880_v48 = vpop.permute.xlu0 %879  ;;  %v3922_v24 = vpop.permute.xlu2 %1354  ;;  %v714_v1 = vld [vmem:[#allocation2 + $0x8] sm:$0xff] }
 0x13f   : > { %567 = vst.msk [vmem:[#allocation2 + $0x38] sm:$0xff] %vm316_vm4, %v559_v60  ;;  %v944_v59 = vsel %vm455_vm3, %v3472_v6, %v880_v48  ;;  %v1182_v6 = vsel %vm455_vm3, %v3476_v12, %v3832_v5 }
 0x140   : > { %v952_v29 = vsel %vm316_vm4, %v944_v59, %v928_v57  ;;  %v3996_v57 = vrot.slane %v3986_v35, 1 }
 0x141   : > { %2712 = vmatmul.msk.f32.gmra.mxu2 %vm482_vm5, %v952_v29  ;;  %v2805_v29 = vld [vmem:[%s4382_s3 + $0x70] sm:$0xff] }
 0x142   : > { %1642 = vrot.lane.b32.xlu2 %v1625_v39, %s2951_s5  ;;  %2204 = vmatpush.msra.mxu3 %v2805_v29 }
 0x143   : > { %1594 = vrot.lane.b32.xlu1 %v1577_v15, %s2950_s30  ;;  %v1628_v15 = vsel %vm406_vm1, %v1389_v45, %v1627_v7  ;;  %v715_v45 = vld [vmem:[#allocation2 + $0x10] sm:$0xff] }
 0x144   : > { %2353 = vrot.lane.b32.xlu0 %v2332_v55, %s2951_s5  ;;  %v1580_v55 = vsel %vm357_vm0, %v1341_v4, %v1579_v32  ;;  %v4027_v4 = vrot.slane %v3986_v35, 2  ;;  %v4071_v7 = vld [vmem:[%s3521_s22 + $0x70] sm:$0xff]  ;;  %v717_v32 = vld [vmem:[#allocation2 + $0x20] sm:$0xff] }
 0x145   : > { %v1165_v21 = vpop.permute.xlu1 %1164 }
 0x146   : > { %v1353_v10 = vpop.permute.xlu0 %1352  ;;  %v1190_v37 = vsel %vm316_vm4, %v1182_v6, %v1165_v21  ;;  %v3953_v40 = vpop.permute.xlu2 %1586  ;;  %v1421_v6 = vsel %vm455_vm3, %v3476_v12, %v3922_v24 }
 0x147   : > { %v1420_v5 = vsel %vm455_vm3, %v3420_v33, %v1353_v10  ;;  %2722 = vmatmul.msk.f32.gmra.mxu3 %vm482_vm5, %v1190_v37  ;;  %v2334_v33 = vrot.slane %v2821_v52, 2  ;;  %v1866_v10 = vrot.slane %v1780_v42, 2 }
 0x148   : > { %v1428_v54 = vsel %vm316_vm4, %v1420_v5, %v3867_v3  ;;  %v713_v3 = vld [vmem:[#allocation2] sm:$0xff] }
 0x149   : > { %2747 = vmatmul.msk.f32.gmra.mxu0 %vm482_vm5, %v1428_v54  ;;  %v2335_v50 = vsel %vm406_vm1, %v3855_v53, %v2334_v33  ;;  %v1818_v53 = vrot.slane %v1780_v42, 1  ;;  %v1867_v52 = vsel %vm406_vm1, %v4027_v4, %v1866_v10  ;;  %v4045_v33 = vld [vmem:[%s3255_s24 + $0x90] sm:$0xff] }
 0x14a   : > { %2071 = vrot.lane.b32.xlu2 %v2053_v26, %s2950_s30 }
 0x14b   : > { %1881 = vrot.lane.b32.xlu1 %v1864_v18, %s2951_s5  ;;  %v1819_v13 = vsel %vm357_vm0, %v3996_v57, %v1818_v53  ;;  %v2290_v18 = vsel %vm357_vm0, %v3950_v31, %v2289_v20  ;;  %v1582_v31 = vrot.slane %v2766_v51, 1  ;;  %v2338_v53 = vsel %vm406_vm1, %v3947_v58, %v2337_v49  ;;  %v2833_v49 = vld [vmem:[%s4382_s3 + $0x88] sm:$0xf] }
 0x14c   : > { %1833 = vrot.lane.b32.xlu0 %v1816_v28, %s2950_s30  ;;  %v2056_v28 = vsel %vm357_vm0, %v3996_v57, %v2055_v27  ;;  %v2825_v27 = vld [vmem:[%s3521_s22 + $0x68] sm:$0x3]  ;;  %2834 = vmatpush.msk.msra.mxu0 %vm507_vm2, %v2833_v49 }
 0x14d   : > { %v768_v46 = vpop.f32.mrf.mxu1  ;;  %v1633_v2 = vpop.permute.xlu1 %1632 }
 0x14e   : > { %v792_v41 = vadd.f32 %v768_v46, %v713_v3  ;;  %v1585_v63 = vpop.permute.xlu0 %1584  ;;  %v3971_v25 = vpop.permute.xlu2 %1873  ;;  %v1581_v3 = vrot.slane %v4045_v33, 1  ;;  %v2904_v46 = vld [vmem:[%s3255_s24 + $0x30] sm:$0xff] }
 0x14f   : > { %v1656_v62 = vsel %vm455_vm3, %v2903_v23, %v1585_v63 }
 0x150   : > { %800 = vst.msk [vmem:[#allocation2] sm:$0xff] %vm316_vm4, %v792_v41  ;;  %v1664_v14 = vsel %vm316_vm4, %v1656_v62, %v1633_v2  ;;  %v1657_v2 = vsel %vm455_vm3, %v2904_v46, %v3953_v40  ;;  %v716_v41 = vld [vmem:[#allocation2 + $0x18] sm:$0xff]  ;;  %v2103_v62 = vrot.slane %v2800_v47, 2  ;;  %v1583_v42 = vsel %vm357_vm0, %v1581_v3, %v1582_v31 }
 0x151   : > { %2770 = vmatmul.msk.f32.vlgmr.msra.gmra.mxu1 %vm482_vm5, %v1664_v14 }
 0x152   : > { %2355 = vrot.lane.b32.xlu2 %v2335_v50, %s2951_s5 }
 0x153   : > { %2119 = vrot.lane.b32.xlu1 %v2101_v22, %s2951_s5 }
 0x154   : > { %2307 = vrot.lane.b32.xlu0 %v2287_v9, %s2950_s30 }
 0x155   : > { %v771_v60 = vpop.f32.mrf.mxu1  ;;  %v1119_v8 = vpop.permute.xlu1 %1118 }
 0x156   : > { %v793_v48 = vadd.f32 %v771_v60, %v714_v1  ;;  %v1872_v59 = vpop.permute.xlu0 %1871  ;;  %v4001_v39 = vpop.permute.xlu2 %1404  ;;  %v1183_v37 = vsel %vm455_vm3, %v3554_v38, %v1119_v8  ;;  %v1782_v1 = vld [vmem:[%s3521_s22 + $0x78] sm:$0x3]  ;;  %v4081_v8 = vrot.slane %v4071_v7, 1 }
 0x157   : > { %v1903_v56 = vsel %vm316_vm4, %v1895_v44, %v1872_v59  ;;  %v2104_v44 = vsel %vm406_vm1, %v4027_v4, %v2103_v62  ;;  %v1869_v60 = vrot.slane %v1782_v1, 2  ;;  %v1821_v58 = vrot.slane %v1782_v1, 1 }
 0x158   : > { %801 = vst.msk [vmem:[#allocation2 + $0x8] sm:$0xff] %vm316_vm4, %v793_v48  ;;  %2781 = vmatmul.msk.f32.vlgmr.msra.gmra.mxu2 %vm482_vm5, %v1903_v56  ;;  %v1629_v59 = vrot.slane %v4045_v33, 2  ;;  %v1630_v56 = vrot.slane %v2766_v51, 2 }
 0x15a   : > { %1835 = vrot.lane.b32.xlu2 %v1819_v13, %s2950_s30  ;;  %v1631_v20 = vsel %vm406_vm1, %v1629_v59, %v1630_v56 }
 0x15b   : > { %1644 = vrot.lane.b32.xlu1 %v1628_v15, %s2951_s5 }
 0x15c   : > { %1596 = vrot.lane.b32.xlu0 %v1580_v55, %s2950_s30 }
 0x15d   : > { %v774_v21 = vpop.f32.mrf.mxu1  ;;  %v1403_v34 = vpop.permute.xlu1 %1402 }
 0x15e   : > { %v794_v5 = vadd.f32 %v774_v21, %v715_v45  ;;  %v1167_v12 = vpop.permute.xlu0 %1166  ;;  %v1429_v24 = vsel %vm316_vm4, %v1421_v6, %v1403_v34  ;;  %v4032_v26 = vpop.permute.xlu2 %1636  ;;  %v1822_v6 = vsel %vm357_vm0, %v4081_v8, %v1821_v58  ;;  %v953_v45 = vld [vmem:[#allocation2] sm:$0xff] }
 0x15f   : > { %v1191_v54 = vsel %vm316_vm4, %v1183_v37, %v1167_v12  ;;  %2748 = vmatmul.msk.f32.gmra.mxu0 %vm482_vm5, %v1429_v24  ;;  %v718_v37 = vld [vmem:[#allocation2 + $0x28] sm:$0xff] }
 0x160   : > { %802 = vst.msk [vmem:[#allocation2 + $0x10] sm:$0xff] %vm316_vm4, %v794_v5  ;;  %2723 = vmatmul.msk.f32.gmra.mxu3 %vm482_vm5, %v1191_v54 }
 0x162   : > { %2309 = vrot.lane.b32.xlu2 %v2290_v18, %s2950_s30 }
 0x163   : > { %2073 = vrot.lane.b32.xlu1 %v2056_v28, %s2950_s30  ;;  %v2905_v28 = vld [vmem:[%s3255_s24 + $0x40] sm:$0xff] }
 0x164   : > { %1883 = vrot.lane.b32.xlu0 %v1867_v52, %s2951_s5 }
 0x165   : > { %v777_v63 = vpop.f32.mrf.mxu1  ;;  %v1826_v23 = vpop.permute.xlu1 %1825 }
 0x166   : > { %v795_v50 = vadd.f32 %v777_v63, %v716_v41  ;;  %v1896_v14 = vsel %vm455_vm3, %v3614_v0, %v1826_v23  ;;  %v1635_v22 = vpop.permute.xlu0 %1634  ;;  %v4057_v9 = vpop.permute.xlu2 %1358  ;;  %v2804_v63 = vld [vmem:[%s3521_s22 + $0x88] sm:$0x3] }
 0x167   : > { %v1665_v61 = vsel %vm316_vm4, %v1657_v2, %v1635_v22  ;;  %v1904_v40 = vsel %vm316_vm4, %v1896_v14, %v3971_v25  ;;  %v4077_v25 = vrot.slane %v4071_v7, 2  ;;  %v954_v23 = vld [vmem:[#allocation2 + $0x8] sm:$0xff]  ;;  %v2061_v14 = vrot.slane %v2804_v63, 1  ;;  %v719_v22 = vld [vmem:[#allocation2 + $0x30] sm:$0xff] }
 0x168   : > { %803 = vst.msk [vmem:[#allocation2 + $0x18] sm:$0xff] %vm316_vm4, %v795_v50  ;;  %2771 = vmatmul.msk.f32.gmra.mxu1 %vm482_vm5, %v1665_v61  ;;  %2782 = vmatmul.msk.f32.gmra.mxu2 %vm482_vm5, %v1904_v40 }
 0x169   : > { %v1870_v47 = vsel %vm406_vm1, %v4077_v25, %v1869_v60  ;;  %v2827_v60 = vld [vmem:[%s3521_s22 + $0x78] sm:$0x3] }
 0x16a   : > { %1598 = vrot.lane.b32.xlu2 %v1583_v42, %s2950_s30  ;;  %v2340_v42 = vrot.slane %v2825_v27, 2  ;;  %v2295_v59 = vrot.slane %v2827_v60, 1 }
 0x16b   : > { %2357 = vrot.lane.b32.xlu1 %v2338_v53, %s2951_s5 }
 0x16c   : > { %2121 = vrot.lane.b32.xlu0 %v2104_v44, %s2951_s5  ;;  %v2341_v56 = vsel %vm406_vm1, %v4027_v4, %v2340_v42  ;;  %v2343_v4 = vrot.slane %v2827_v60, 2 }
 0x16d   : > { %v780_v19 = vpop.f32.mrf.mxu1  ;;  %v2064_v48 = vpop.permute.xlu1 %2063 }
 0x16e   : > { %v796_v13 = vadd.f32 %v780_v19, %v717_v32  ;;  %v1357_v29 = vpop.permute.xlu0 %1356  ;;  %v4084_v15 = vpop.permute.xlu2 %2113  ;;  %v2135_v54 = vsel %vm455_vm3, %v3614_v0, %v2064_v48  ;;  %v2832_v32 = vld [vmem:[%s4382_s3 + $0x80] sm:$0xff] }
 0x16f   : > { %v1422_v55 = vsel %vm455_vm3, %v3554_v38, %v1357_v29  ;;  %v2802_v38 = vld [vmem:[%s3521_s22 + $0x78] sm:$0x3]  ;;  %2444 = vmatpush.msra.mxu0 %v2832_v32 }
 0x170   : > { %804 = vst.msk [vmem:[#allocation2 + $0x20] sm:$0xff] %vm316_vm4, %v796_v13  ;;  %v1430_v43 = vsel %vm316_vm4, %v1422_v55, %v4001_v39  ;;  %v2106_v10 = vrot.slane %v2802_v38, 2  ;;  %v2292_v39 = vrot.slane %v2825_v27, 1  ;;  %v2058_v24 = vrot.slane %v2802_v38, 1  ;;  %v955_v13 = vld [vmem:[#allocation2 + $0x10] sm:$0xff] }
 0x171   : > { %2749 = vmatmul.msk.f32.gmra.mxu0 %vm482_vm5, %v1430_v43  ;;  %v2296_v55 = vsel %vm357_vm0, %v4081_v8, %v2295_v59 }
 0x172   : > { %v1008_v21 = vpop.f32.mrf.mxu2  ;;  %1885 = vrot.lane.b32.xlu2 %v1870_v47, %s2951_s5  ;;  %v2107_v2 = vsel %vm406_vm1, %v4077_v25, %v2106_v10  ;;  %v2293_v0 = vsel %vm357_vm0, %v3996_v57, %v2292_v39  ;;  %v2059_v41 = vsel %vm357_vm0, %v4081_v8, %v2058_v24  ;;  %v1423_v47 = vsel %vm455_vm3, %v3710_v11, %v4057_v9 }
 0x173   : > { %v1032_v34 = vadd.f32 %v1008_v21, %v953_v45  ;;  %1837 = vrot.lane.b32.xlu1 %v1822_v6, %s2950_s30  ;;  %v720_v45 = vld [vmem:[#allocation2 + $0x38] sm:$0xff]  ;;  %v2109_v9 = vrot.slane %v2804_v63, 2 }
 0x174   : > { %1646 = vrot.lane.b32.xlu0 %v1631_v20, %s2951_s5 }
 0x175   : > { %1040 = vst.msk [vmem:[#allocation2] sm:$0xff] %vm316_vm4, %v1032_v34  ;;  %v783_v5 = vpop.f32.mrf.mxu1  ;;  %v1589_v12 = vpop.permute.xlu1 %1588 }
 0x176   : > { %v797_v18 = vadd.f32 %v783_v5, %v718_v37  ;;  %v1658_v52 = vsel %vm455_vm3, %v2905_v28, %v1589_v12  ;;  %v2112_v51 = vpop.permute.xlu0 %2111  ;;  %v4107_v3 = vpop.permute.xlu2 %1829  ;;  %v2829_v37 = vld [vmem:[%s3521_s22 + $0x88] sm:$0x3]  ;;  %v2344_v12 = vsel %vm406_vm1, %v4077_v25, %v2343_v4  ;;  %v2831_v28 = vld [vmem:[%s3521_s22 + $0x98] sm:$0x3] }
 0x177   : > { %v2143_v31 = vsel %vm316_vm4, %v2135_v54, %v2112_v51  ;;  %v1666_v46 = vsel %vm316_vm4, %v1658_v52, %v4032_v26  ;;  %v4125_v26 = vld [vmem:[%s3521_s22 + $0x80] sm:$0xff]  ;;  %v2298_v24 = vrot.slane %v2829_v37, 1  ;;  %v956_v51 = vld [vmem:[#allocation2 + $0x18] sm:$0xff] }
 0x178   : > { %805 = vst.msk [vmem:[#allocation2 + $0x28] sm:$0xff] %vm316_vm4, %v797_v18  ;;  %2808 = vmatmul.msk.f32.vlgmr.msra.gmra.mxu3 %vm482_vm5, %v2143_v31  ;;  %2772 = vmatmul.msk.f32.gmra.mxu1 %vm482_vm5, %v1666_v46  ;;  %v2060_v57 = vrot.slane %v4125_v26, 1  ;;  %v2108_v11 = vrot.slane %v4125_v26, 2  ;;  %v4172_v18 = vld [vmem:[%s3521_s22 + $0x90] sm:$0xff] }
 0x179   : > { %v2300_v49 = vrot.slane %v4172_v18, 1 }
 0x17a   : > { %v1011_v62 = vpop.f32.mrf.mxu2  ;;  %2123 = vrot.lane.b32.xlu2 %v2107_v2, %s2951_s5  ;;  %v2062_v48 = vsel %vm357_vm0, %v2060_v57, %v2061_v14  ;;  %v2110_v54 = vsel %vm406_vm1, %v2108_v11, %v2109_v9  ;;  %v2299_v46 = vsel %vm357_vm0, %v2060_v57, %v2298_v24 }
 0x17b   : > { %v1033_v50 = vadd.f32 %v1011_v62, %v954_v23  ;;  %2311 = vrot.lane.b32.xlu1 %v2293_v0, %s2950_s30  ;;  %v2346_v62 = vrot.slane %v2829_v37, 2 }
 0x17c   : > { %2075 = vrot.lane.b32.xlu0 %v2059_v41, %s2950_s30  ;;  %v1192_v6 = vld [vmem:[#allocation2] sm:$0xff]  ;;  %v2301_v41 = vrot.slane %v2831_v28, 1 }
 0x17d   : > { %1041 = vst.msk [vmem:[#allocation2 + $0x8] sm:$0xff] %vm316_vm4, %v1033_v50  ;;  %v786_v61 = vpop.f32.mrf.mxu1  ;;  %v1876_v40 = vpop.permute.xlu1 %1875 }
 0x17e   : > { %v798_v53 = vadd.f32 %v786_v61, %v719_v22  ;;  %v1828_v44 = vpop.permute.xlu0 %1827  ;;  %v4137_v58 = vpop.permute.xlu2 %2303  ;;  %v2906_v22 = vld [vmem:[%s3255_s24 + $0x50] sm:$0xff]  ;;  %v2302_v42 = vsel %vm357_vm0, %v2300_v49, %v2301_v41 }
 0x17f   : > { %v1897_v1 = vsel %vm455_vm3, %v3706_v17, %v1828_v44  ;;  %v2348_v44 = vrot.slane %v4172_v18, 2 }
 0x180   : > { %806 = vst.msk [vmem:[#allocation2 + $0x30] sm:$0xff] %vm316_vm4, %v798_v53  ;;  %v1905_v19 = vsel %vm316_vm4, %v1897_v1, %v1876_v40  ;;  %v2347_v53 = vsel %vm406_vm1, %v2108_v11, %v2346_v62  ;;  %v2349_v1 = vrot.slane %v2831_v28, 2 }
 0x181   : > { %2783 = vmatmul.msk.f32.gmra.mxu2 %vm482_vm5, %v1905_v19 }
 0x182   : > { %v1014_v29 = vpop.f32.mrf.mxu2  ;;  %2313 = vrot.lane.b32.xlu2 %v2296_v55, %s2950_s30 }
 0x183   : > { %v1034_v43 = vadd.f32 %v1014_v29, %v955_v13  ;;  %v1247_v20 = vpop.f32.mrf.mxu3  ;;  %2077 = vrot.lane.b32.xlu1 %v2062_v48, %s2950_s30  ;;  %v1898_v48 = vsel %vm455_vm3, %v3775_v30, %v4107_v3  ;;  %v957_v3 = vld [vmem:[#allocation2 + $0x20] sm:$0xff] }
 0x184   : > { %v1271_v27 = vadd.f32 %v1247_v20, %v1192_v6  ;;  %2359 = vrot.lane.b32.xlu0 %v2341_v56, %s2951_s5  ;;  %v1193_v0 = vld [vmem:[#allocation2 + $0x8] sm:$0xff]  ;;  %v2350_v56 = vsel %vm406_vm1, %v2348_v44, %v2349_v1 }
 0x185   : > { %1042 = vst.msk [vmem:[#allocation2 + $0x10] sm:$0xff] %vm316_vm4, %v1034_v43  ;;  %v789_v8 = vpop.f32.mrf.mxu1  ;;  %v1407_v21 = vpop.permute.xlu1 %1406 }
 0x186   : > { %1279 = vst.msk [vmem:[#allocation2] sm:$0xff] %vm316_vm4, %v1271_v27  ;;  %v799_v38 = vadd.f32 %v789_v8, %v720_v45  ;;  %v2066_v34 = vpop.permute.xlu0 %2065  ;;  %v1431_v10 = vsel %vm316_vm4, %v1423_v47, %v1407_v21  ;;  %v4175_v52 = vpop.permute.xlu2 %1592  ;;  %v2375_v47 = vsel %vm455_vm3, %v3706_v17, %v4137_v58  ;;  %v958_v58 = vld [vmem:[#allocation2 + $0x28] sm:$0xff] }
 0x187   : > { %v2136_v39 = vsel %vm455_vm3, %v3706_v17, %v2066_v34  ;;  %2750 = vmatmul.msk.f32.gmra.mxu0 %vm482_vm5, %v1431_v10 }
 0x188   : > { %807 = vst.msk [vmem:[#allocation2 + $0x38] sm:$0xff] %vm316_vm4, %v799_v38  ;;  %v2144_v5 = vsel %vm316_vm4, %v2136_v39, %v4084_v15  ;;  %v2907_v39 = vld [vmem:[%s3255_s24 + $0x60] sm:$0xff] }
 0x189   : > { %2809 = vmatmul.msk.f32.gmra.mxu3 %vm482_vm5, %v2144_v5  ;;  %v1660_v37 = vsel %vm455_vm3, %v2907_v39, %v4175_v52 }
 0x18a   : > { %v1017_v31 = vpop.f32.mrf.mxu2  ;;  %2315 = vrot.lane.b32.xlu2 %v2299_v46, %s2950_s30 }
 0x18b   : > { %v1035_v2 = vadd.f32 %v1017_v31, %v956_v51  ;;  %v1250_v15 = vpop.f32.mrf.mxu3  ;;  %2361 = vrot.lane.b32.xlu1 %v2344_v12, %s2951_s5 }
 0x18c   : > { %v1272_v25 = vadd.f32 %v1250_v15, %v1193_v0  ;;  %2125 = vrot.lane.b32.xlu0 %v2110_v54, %s2951_s5  ;;  %v1194_v60 = vld [vmem:[#allocation2 + $0x10] sm:$0xff] }
 0x18d   : > { %1043 = vst.msk [vmem:[#allocation2 + $0x18] sm:$0xff] %vm316_vm4, %v1035_v2  ;;  %v1639_v63 = vpop.permute.xlu1 %1638  ;;  %v1432_v23 = vld [vmem:[#allocation2] sm:$0xff] }
 0x18e   : > { %1280 = vst.msk [vmem:[#allocation2 + $0x8] sm:$0xff] %vm316_vm4, %v1272_v25  ;;  %v1487_v50 = vpop.f32.mrf.mxu0  ;;  %v1591_v57 = vpop.permute.xlu0 %1590 }
 0x18f   : > { %v1511_v14 = vadd.f32 %v1487_v50, %v1432_v23  ;;  %v1659_v61 = vsel %vm455_vm3, %v2906_v22, %v1591_v57  ;;  %v1880_v19 = vpop.permute.xlu2 %1879  ;;  %v959_v57 = vld [vmem:[#allocation2 + $0x30] sm:$0xff] }
 0x190   : > { %v1667_v40 = vsel %vm316_vm4, %v1659_v61, %v1639_v63 }
 0x191   : > { %1519 = vst.msk [vmem:[#allocation2] sm:$0xff] %vm316_vm4, %v1511_v14  ;;  %2773 = vmatmul.msk.f32.gmra.mxu1 %vm482_vm5, %v1667_v40 }
 0x192   : > { %2365 = vrot.lane.b32.xlu2 %v2350_v56, %s2951_s5 }
 0x193   : > { %v1253_v32 = vpop.f32.mrf.mxu3  ;;  %2317 = vrot.lane.b32.xlu1 %v2302_v42, %s2950_s30  ;;  %v2908_v42 = vld [vmem:[%s3255_s24 + $0x70] sm:$0xff]  ;;  %s2647_s30 = sshll.u32 %s4401_s15, 3 }
 0x194   : > { %v1273_v59 = vadd.f32 %v1253_v32, %v1194_v60  ;;  %2363 = vrot.lane.b32.xlu0 %v2347_v53, %s2951_s5  ;;  %v1195_v34 = vld [vmem:[#allocation2 + $0x18] sm:$0xff]  ;;  %s2648_s5 = sshll.u32 %s4395_s16, 6 }
 0x195   : > { %v2068_v13 = vpop.permute.xlu1 %2067  ;;  %v1433_v20 = vld [vmem:[#allocation2 + $0x8] sm:$0xff] }
 0x196   : > { %1281 = vst.msk [vmem:[#allocation2 + $0x10] sm:$0xff] %vm316_vm4, %v1273_v59  ;;  %v1878_v29 = vpop.permute.xlu0 %1877  ;;  %v2137_v21 = vsel %vm455_vm3, %v3775_v30, %v2068_v13 }
 0x197   : > { %v1906_v55 = vsel %vm316_vm4, %v1898_v48, %v1878_v29  ;;  %v2118_v8 = vpop.permute.xlu2 %2117 }
 0x198   : > { %2784 = vmatmul.msk.f32.gmra.mxu2 %vm482_vm5, %v1906_v55 }
 0x19b   : > { %v1020_v43 = vpop.f32.mrf.mxu2 }
 0x19c   : > { %v1036_v6 = vadd.f32 %v1020_v43, %v957_v3  ;;  %v1490_v27 = vpop.f32.mrf.mxu0 }
 0x19d   : > { %v1512_v4 = vadd.f32 %v1490_v27, %v1433_v20  ;;  %v2352_v45 = vpop.permute.xlu1 %2351  ;;  %v1434_v15 = vld [vmem:[#allocation2 + $0x10] sm:$0xff] }
 0x19e   : > { %1044 = vst.msk [vmem:[#allocation2 + $0x20] sm:$0xff] %vm316_vm4, %v1036_v6  ;;  %v2383_v11 = vsel %vm316_vm4, %v2375_v47, %v2352_v45  ;;  %v2116_v9 = vpop.permute.xlu0 %2115  ;;  %v960_v6 = vld [vmem:[#allocation2 + $0x38] sm:$0xff] }
 0x19f   : > { %1520 = vst.msk [vmem:[#allocation2 + $0x8] sm:$0xff] %vm316_vm4, %v1512_v4  ;;  %v2145_v17 = vsel %vm316_vm4, %v2137_v21, %v2116_v9  ;;  %2835 = vmatmul.msk.f32.vlgmr.msra.gmra.mxu0 %vm482_vm5, %v2383_v11  ;;  %v1643_v46 = vpop.permute.xlu2 %1642 }
 0x1a0   : > { %2810 = vmatmul.msk.f32.gmra.mxu3 %vm482_vm5, %v2145_v17 }
 0x1a3   : > { %v1023_v38 = vpop.f32.mrf.mxu2  ;;  %v1256_v10 = vpop.f32.mrf.mxu3 }
 0x1a4   : > { %v1037_v5 = vadd.f32 %v1023_v38, %v958_v58  ;;  %v1274_v12 = vadd.f32 %v1256_v10, %v1195_v34 }
 0x1a5   : > { %v1832_v24 = vpop.permute.xlu1 %1831  ;;  %v1196_v52 = vld [vmem:[#allocation2 + $0x20] sm:$0xff] }
 0x1a6   : > { %1045 = vst.msk [vmem:[#allocation2 + $0x28] sm:$0xff] %vm316_vm4, %v1037_v5  ;;  %v1899_v54 = vsel %vm455_vm3, %v3849_v36, %v1832_v24  ;;  %v1641_v28 = vpop.permute.xlu0 %1640  ;;  %v1672_v5 = vld [vmem:[#allocation2] sm:$0xff] }
 0x1a7   : > { %1282 = vst.msk [vmem:[#allocation2 + $0x18] sm:$0xff] %vm316_vm4, %v1274_v12  ;;  %v1668_v51 = vsel %vm316_vm4, %v1660_v37, %v1641_v28  ;;  %v1907_v31 = vsel %vm316_vm4, %v1899_v54, %v1880_v19  ;;  %v2072_v50 = vpop.permute.xlu2 %2071  ;;  %v2909_v28 = vld [vmem:[%s3255_s24 + $0x80] sm:$0xff]  ;;  %s313_s24 = sadd.s32 %s2648_s5, %s2647_s30 }
 0x1a8   : > { %2774 = vmatmul.msk.f32.gmra.mxu1 %vm482_vm5, %v1668_v51  ;;  %2785 = vmatmul.msk.f32.gmra.mxu2 %vm482_vm5, %v1907_v31  ;;  %v2139_v43 = vsel %vm455_vm3, %v3936_v16, %v2072_v50  ;;  %s2649_s22 = sshll.u32 %s313_s24, 3 }
 0x1a9   : > { %s4325_s23 = scalar_lea.vmem %s4383_s4, %s2649_s22 }
 0x1ac   : > { %v1259_v2 = vpop.f32.mrf.mxu3 }
 0x1ad   : > { %v1275_v0 = vadd.f32 %v1259_v2, %v1196_v52  ;;  %v1493_v25 = vpop.f32.mrf.mxu0  ;;  %v2306_v49 = vpop.permute.xlu1 %2305  ;;  %v1197_v59 = vld [vmem:[#allocation2 + $0x28] sm:$0xff] }
 0x1ae   : > { %v1513_v41 = vadd.f32 %v1493_v25, %v1434_v15  ;;  %v2070_v63 = vpop.permute.xlu0 %2069  ;;  %v2376_v40 = vsel %vm455_vm3, %v3775_v30, %v2306_v49  ;;  %v1435_v44 = vld [vmem:[#allocation2 + $0x18] sm:$0xff] }
 0x1af   : > { %1283 = vst.msk [vmem:[#allocation2 + $0x20] sm:$0xff] %vm316_vm4, %v1275_v0  ;;  %v2138_v23 = vsel %vm455_vm3, %v3849_v36, %v2070_v63  ;;  %v2356_v13 = vpop.permute.xlu2 %2355 }
 0x1b0   : > { %1521 = vst.msk [vmem:[#allocation2 + $0x10] sm:$0xff] %vm316_vm4, %v1513_v41  ;;  %v2146_v62 = vsel %vm316_vm4, %v2138_v23, %v2118_v8 }
 0x1b1   : > { %2811 = vmatmul.msk.f32.gmra.mxu3 %vm482_vm5, %v2146_v62 }
 0x1b2   : > { %v1026_v14 = vpop.f32.mrf.mxu2 }
 0x1b3   : > { %v1038_v22 = vadd.f32 %v1026_v14, %v959_v57 }
 0x1b5   : > { %1046 = vst.msk [vmem:[#allocation2 + $0x30] sm:$0xff] %vm316_vm4, %v1038_v22  ;;  %v1595_v61 = vpop.permute.xlu1 %1594 }
 0x1b6   : > { %v1661_v53 = vsel %vm455_vm3, %v2908_v42, %v1595_v61  ;;  %v1496_v1 = vpop.f32.mrf.mxu0  ;;  %v2354_v60 = vpop.permute.xlu0 %2353  ;;  %v1436_v8 = vld [vmem:[#allocation2 + $0x20] sm:$0xff] }
 0x1b7   : > { %v1514_v32 = vadd.f32 %v1496_v1, %v1435_v44  ;;  %v2384_v19 = vsel %vm316_vm4, %v2376_v40, %v2354_v60  ;;  %v1669_v48 = vsel %vm316_vm4, %v1661_v53, %v1643_v46  ;;  %v1836_v45 = vpop.permute.xlu2 %1835  ;;  %v1673_v60 = vld [vmem:[#allocation2 + $0x8] sm:$0xff] }
 0x1b8   : > { %2836 = vmatmul.msk.f32.gmra.mxu0 %vm482_vm5, %v2384_v19  ;;  %2775 = vmatmul.msk.f32.gmra.mxu1 %vm482_vm5, %v1669_v48  ;;  %v1901_v46 = vsel %vm455_vm3, %v3986_v35, %v1836_v45 }
 0x1b9   : > { %1522 = vst.msk [vmem:[#allocation2 + $0x18] sm:$0xff] %vm316_vm4, %v1514_v32 }
 0x1ba   : > { %v1262_v56 = vpop.f32.mrf.mxu3 }
 0x1bb   : > { %v1276_v30 = vadd.f32 %v1262_v56, %v1197_v59 }
 0x1bc   : > { %v1198_v34 = vld [vmem:[#allocation2 + $0x30] sm:$0xff] }
 0x1bd   : > { %1284 = vst.msk [vmem:[#allocation2 + $0x28] sm:$0xff] %vm316_vm4, %v1276_v30  ;;  %v1882_v29 = vpop.permute.xlu1 %1881 }
 0x1be   : > { %v1834_v55 = vpop.permute.xlu0 %1833 }
 0x1bf   : > { %v1900_v47 = vsel %vm455_vm3, %v3936_v16, %v1834_v55  ;;  %v2310_v51 = vpop.permute.xlu2 %2309 }
 0x1c0   : > { %v1908_v3 = vsel %vm316_vm4, %v1900_v47, %v1882_v29  ;;  %v2378_v25 = vsel %vm455_vm3, %v3936_v16, %v2310_v51 }
 0x1c1   : > { %2786 = vmatmul.msk.f32.gmra.mxu2 %vm482_vm5, %v1908_v3 }
 0x1c4   : > { %v1029_v20 = vpop.f32.mrf.mxu2  ;;  %v1437_v23 = vld [vmem:[#allocation2 + $0x28] sm:$0xff] }
 0x1c5   : > { %v1039_v27 = vadd.f32 %v1029_v20, %v960_v6  ;;  %v2120_v4 = vpop.permute.xlu1 %2119 }
 0x1c6   : > { %v1499_v21 = vpop.f32.mrf.mxu0  ;;  %v2308_v11 = vpop.permute.xlu0 %2307  ;;  %v2147_v9 = vsel %vm316_vm4, %v2139_v43, %v2120_v4 }
 0x1c7   : > { %1047 = vst.msk [vmem:[#allocation2 + $0x38] sm:$0xff] %vm316_vm4, %v1039_v27  ;;  %v1515_v17 = vadd.f32 %v1499_v21, %v1436_v8  ;;  %v2377_v58 = vsel %vm455_vm3, %v3849_v36, %v2308_v11  ;;  %2812 = vmatmul.msk.f32.gmra.mxu3 %vm482_vm5, %v2147_v9  ;;  %v1599_v15 = vpop.permute.xlu2 %1598  ;;  %v1674_v21 = vld [vmem:[#allocation2 + $0x10] sm:$0xff] }
 0x1c8   : > { %v2385_v38 = vsel %vm316_vm4, %v2377_v58, %v2356_v13  ;;  %v1663_v44 = vsel %vm455_vm3, %v4045_v33, %v1599_v15 }
 0x1c9   : > { %1523 = vst.msk [vmem:[#allocation2 + $0x20] sm:$0xff] %vm316_vm4, %v1515_v17  ;;  %2837 = vmatmul.msk.f32.gmra.mxu0 %vm482_vm5, %v2385_v38 }
 0x1ca   : > { %v1265_v10 = vpop.f32.mrf.mxu3 }
 0x1cb   : > { %v1277_v39 = vadd.f32 %v1265_v10, %v1198_v34 }
 0x1cd   : > { %1285 = vst.msk [vmem:[#allocation2 + $0x30] sm:$0xff] %vm316_vm4, %v1277_v39  ;;  %v1645_v37 = vpop.permute.xlu1 %1644 }
 0x1ce   : > { %v1727_v12 = vpop.f32.mrf.mxu1  ;;  %v1597_v24 = vpop.permute.xlu0 %1596  ;;  %v1199_v16 = vld [vmem:[#allocation2 + $0x38] sm:$0xff] }
 0x1cf   : > { %v1751_v54 = vadd.f32 %v1727_v12, %v1672_v5  ;;  %v1662_v36 = vsel %vm455_vm3, %v2909_v28, %v1597_v24  ;;  %v1886_v53 = vpop.permute.xlu2 %1885 }
 0x1d0   : > { %v1670_v31 = vsel %vm316_vm4, %v1662_v36, %v1645_v37 }
 0x1d1   : > { %1759 = vst.msk [vmem:[#allocation2] sm:$0xff] %vm316_vm4, %v1751_v54  ;;  %2776 = vmatmul.msk.f32.gmra.mxu1 %vm482_vm5, %v1670_v31 }
 0x1d4   : > { %v1438_v55 = vld [vmem:[#allocation2 + $0x30] sm:$0xff] }
 0x1d5   : > { %v2074_v52 = vpop.permute.xlu1 %2073 }
 0x1d6   : > { %v1884_v2 = vpop.permute.xlu0 %1883  ;;  %v2140_v14 = vsel %vm455_vm3, %v3986_v35, %v2074_v52 }
 0x1d7   : > { %v1909_v0 = vsel %vm316_vm4, %v1901_v46, %v1884_v2  ;;  %v2124_v29 = vpop.permute.xlu2 %2123 }
 0x1d8   : > { %2787 = vmatmul.msk.f32.gmra.mxu2 %vm482_vm5, %v1909_v0  ;;  %v1911_v49 = vld [vmem:[#allocation2] sm:$0xff] }
 0x1db   : > { %v1966_v41 = vpop.f32.mrf.mxu2 }
 0x1dc   : > { %v1990_v63 = vadd.f32 %v1966_v41, %v1911_v49  ;;  %v1502_v62 = vpop.f32.mrf.mxu0 }
 0x1dd   : > { %v1516_v50 = vadd.f32 %v1502_v62, %v1437_v23  ;;  %v2358_v57 = vpop.permute.xlu1 %2357 }
 0x1de   : > { %1998 = vst.msk [vmem:[#allocation2] sm:$0xff] %vm316_vm4, %v1990_v63  ;;  %v2122_v22 = vpop.permute.xlu0 %2121  ;;  %v2386_v61 = vsel %vm316_vm4, %v2378_v25, %v2358_v57  ;;  %v1675_v57 = vld [vmem:[#allocation2 + $0x18] sm:$0xff] }
 0x1df   : > { %1524 = vst.msk [vmem:[#allocation2 + $0x28] sm:$0xff] %vm316_vm4, %v1516_v50  ;;  %v2148_v40 = vsel %vm316_vm4, %v2140_v14, %v2122_v22  ;;  %2838 = vmatmul.msk.f32.gmra.mxu0 %vm482_vm5, %v2386_v61  ;;  %v2314_v38 = vpop.permute.xlu2 %2313 }
 0x1e0   : > { %2813 = vmatmul.msk.f32.gmra.mxu3 %vm482_vm5, %v2148_v40  ;;  %v2380_v37 = vsel %vm455_vm3, %v4071_v7, %v2314_v38 }
 0x1e3   : > { %v1268_v42 = vpop.f32.mrf.mxu3 }
 0x1e4   : > { %v1278_v1 = vadd.f32 %v1268_v42, %v1199_v16 }
 0x1e5   : > { %v1730_v32 = vpop.f32.mrf.mxu1  ;;  %v1838_v19 = vpop.permute.xlu1 %1837  ;;  %v2151_v10 = vld [vmem:[#allocation2] sm:$0xff] }
 0x1e6   : > { %1286 = vst.msk [vmem:[#allocation2 + $0x38] sm:$0xff] %vm316_vm4, %v1278_v1  ;;  %v1752_v48 = vadd.f32 %v1730_v32, %v1673_v60  ;;  %v1902_v59 = vsel %vm455_vm3, %v4071_v7, %v1838_v19  ;;  %v1647_v56 = vpop.permute.xlu0 %1646  ;;  %v1676_v32 = vld [vmem:[#allocation2 + $0x20] sm:$0xff] }
 0x1e7   : > { %v1671_v30 = vsel %vm316_vm4, %v1663_v44, %v1647_v56  ;;  %v1910_v13 = vsel %vm316_vm4, %v1902_v59, %v1886_v53  ;;  %v2316_v36 = vpop.permute.xlu2 %2315 }
 0x1e8   : > { %1760 = vst.msk [vmem:[#allocation2 + $0x8] sm:$0xff] %vm316_vm4, %v1752_v48  ;;  %2777 = vmatmul.msk.f32.gmra.mxu1 %vm482_vm5, %v1671_v30  ;;  %2788 = vmatmul.msk.f32.gmra.mxu2 %vm482_vm5, %v1910_v13 }
 0x1eb   : > { %v1969_v6 = vpop.f32.mrf.mxu2 }
 0x1ed   : > { %v2312_v33 = vpop.permute.xlu1 %2311  ;;  %v1439_v46 = vld [vmem:[#allocation2 + $0x38] sm:$0xff] }
 0x1ee   : > { %v1505_v47 = vpop.f32.mrf.mxu0  ;;  %v2076_v3 = vpop.permute.xlu0 %2075  ;;  %v2379_v9 = vsel %vm455_vm3, %v3986_v35, %v2312_v33 }
 0x1ef   : > { %v1912_v43 = vld [vmem:[#allocation2 + $0x8] sm:$0xff]  ;;  %v1517_v20 = vadd.f32 %v1505_v47, %v1438_v55  ;;  %v2141_v27 = vsel %vm455_vm3, %v4071_v7, %v2076_v3  ;;  %v2381_v7 = vsel %vm455_vm3, %v4125_v26, %v2316_v36 }
 0x1f0   : > { %v1991_v4 = vadd.f32 %v1969_v6, %v1912_v43  ;;  %v2149_v45 = vsel %vm316_vm4, %v2141_v27, %v2124_v29  ;;  %v1677_v43 = vld [vmem:[#allocation2 + $0x28] sm:$0xff] }
 0x1f1   : > { %1525 = vst.msk [vmem:[#allocation2 + $0x30] sm:$0xff] %vm316_vm4, %v1517_v20  ;;  %2814 = vmatmul.msk.f32.gmra.mxu3 %vm482_vm5, %v2149_v45 }
 0x1f2   : > { %1999 = vst.msk [vmem:[#allocation2 + $0x8] sm:$0xff] %vm316_vm4, %v1991_v4 }
 0x1f5   : > { %v2078_v8 = vpop.permute.xlu1 %2077  ;;  %v1733_v11 = vpop.f32.mrf.mxu1 }
 0x1f6   : > { %v1753_v17 = vadd.f32 %v1733_v11, %v1674_v21  ;;  %v2360_v58 = vpop.permute.xlu0 %2359  ;;  %v2142_v24 = vsel %vm455_vm3, %v4125_v26, %v2078_v8  ;;  %v2366_v26 = vpop.permute.xlu2 %2365 }
 0x1f7   : > { %v2387_v34 = vsel %vm316_vm4, %v2379_v9, %v2360_v58 }
 0x1f8   : > { %1761 = vst.msk [vmem:[#allocation2 + $0x10] sm:$0xff] %vm316_vm4, %v1753_v17  ;;  %2839 = vmatmul.msk.f32.gmra.mxu0 %vm482_vm5, %v2387_v34 }
 0x1f9   : > { %v2152_v63 = vld [vmem:[#allocation2 + $0x8] sm:$0xff] }
 0x1fb   : > { %v2206_v39 = vpop.f32.mrf.mxu3 }
 0x1fc   : > { %v2230_v5 = vadd.f32 %v2206_v39, %v2151_v10  ;;  %v1678_v10 = vld [vmem:[#allocation2 + $0x30] sm:$0xff] }
 0x1fd   : > { %v2362_v12 = vpop.permute.xlu1 %2361 }
 0x1fe   : > { %2238 = vst.msk [vmem:[#allocation2] sm:$0xff] %vm316_vm4, %v2230_v5  ;;  %v2126_v35 = vpop.permute.xlu0 %2125  ;;  %v2388_v54 = vsel %vm316_vm4, %v2380_v37, %v2362_v12 }
 0x1ff   : > { %v2150_v28 = vsel %vm316_vm4, %v2142_v24, %v2126_v35  ;;  %v1913_v51 = vld [vmem:[#allocation2 + $0x10] sm:$0xff] }
 0x200   : > { %2815 = vmatmul.msk.f32.gmra.mxu3 %vm482_vm5, %v2150_v28  ;;  %2840 = vmatmul.msk.f32.gmra.mxu0 %vm482_vm5, %v2388_v54 }
 0x204   : > { %v1972_v31 = vpop.f32.mrf.mxu2  ;;  %v1508_v52 = vpop.f32.mrf.mxu0 }
 0x205   : > { %v1992_v2 = vadd.f32 %v1972_v31, %v1913_v51  ;;  %v1518_v0 = vadd.f32 %v1508_v52, %v1439_v46  ;;  %v2318_v49 = vpop.permute.xlu1 %2317  ;;  %v2391_v16 = vld [vmem:[#allocation2] sm:$0xff] }
 0x206   : > { %v2364_v15 = vpop.permute.xlu0 %2363  ;;  %v2382_v41 = vsel %vm455_vm3, %v4172_v18, %v2318_v49 }
 0x207   : > { %2000 = vst.msk [vmem:[#allocation2 + $0x10] sm:$0xff] %vm316_vm4, %v1992_v2  ;;  %v2389_v25 = vsel %vm316_vm4, %v2381_v7, %v2364_v15  ;;  %v2390_v50 = vsel %vm316_vm4, %v2382_v41, %v2366_v26 }
 0x208   : > { %1526 = vst.msk [vmem:[#allocation2 + $0x38] sm:$0xff] %vm316_vm4, %v1518_v0  ;;  %2841 = vmatmul.msk.f32.gmra.mxu0 %vm482_vm5, %v2389_v25 }
 0x20c   : > { %v2209_v23 = vpop.f32.mrf.mxu3 }
 0x20d   : > { %v2231_v62 = vadd.f32 %v2209_v23, %v2152_v63 }
 0x20e   : > { %v1736_v14 = vpop.f32.mrf.mxu1  ;;  %v2153_v44 = vld [vmem:[#allocation2 + $0x10] sm:$0xff] }
 0x20f   : > { %2239 = vst.msk [vmem:[#allocation2 + $0x8] sm:$0xff] %vm316_vm4, %v2231_v62  ;;  %v1754_v22 = vadd.f32 %v1736_v14, %v1675_v57  ;;  %v1679_v46 = vld [vmem:[#allocation2 + $0x38] sm:$0xff] }
 0x210   : > { %2842 = vmatmul.msk.f32.gmra.mxu0 %vm482_vm5, %v2390_v50 }
 0x211   : > { %1762 = vst.msk [vmem:[#allocation2 + $0x18] sm:$0xff] %vm316_vm4, %v1754_v22 }
 0x216   : > { %v2392_v47 = vld [vmem:[#allocation2 + $0x8] sm:$0xff] }
 0x218   : > { %v1914_v61 = vld [vmem:[#allocation2 + $0x18] sm:$0xff] }
 0x21b   : > { %v1975_v18 = vpop.f32.mrf.mxu2 }
 0x21c   : > { %v1993_v40 = vadd.f32 %v1975_v18, %v1914_v61  ;;  %v2446_v42 = vpop.f32.mrf.mxu0 }
 0x21d   : > { %v2470_v53 = vadd.f32 %v2446_v42, %v2391_v16 }
 0x21e   : > { %2001 = vst.msk [vmem:[#allocation2 + $0x18] sm:$0xff] %vm316_vm4, %v1993_v40 }
 0x21f   : > { %2478 = vst.msk [vmem:[#allocation2] sm:$0xff] %vm316_vm4, %v2470_v53 }
 0x223   : > { %v2212_v1 = vpop.f32.mrf.mxu3 }
 0x224   : > { %v2232_v60 = vadd.f32 %v2212_v1, %v2153_v44 }
 0x225   : > { %v1739_v19 = vpop.f32.mrf.mxu1  ;;  %v2154_v33 = vld [vmem:[#allocation2 + $0x18] sm:$0xff] }
 0x226   : > { %v2486_v48 = vld [vmem:[#allocation2] sm:$0xff]  ;;  %2240 = vst.msk [vmem:[#allocation2 + $0x10] sm:$0xff] %vm316_vm4, %v2232_v60  ;;  %v1755_v59 = vadd.f32 %v1739_v19, %v1676_v32 }
 0x227   : > { %2494 = vst.msk [vmem:[%s4325_s23] sm:$0xff] %vm316_vm4, %v2486_v48 }
 0x228   : > { %1763 = vst.msk [vmem:[#allocation2 + $0x20] sm:$0xff] %vm316_vm4, %v1755_v59 }
 0x22b   : > { %v1978_v30 = vpop.f32.mrf.mxu2 }
 0x22d   : > { %v2393_v11 = vld [vmem:[#allocation2 + $0x10] sm:$0xff] }
 0x22f   : > { %v1915_v56 = vld [vmem:[#allocation2 + $0x20] sm:$0xff] }
 0x230   : > { %v1994_v13 = vadd.f32 %v1978_v30, %v1915_v56 }
 0x232   : > { %2002 = vst.msk [vmem:[#allocation2 + $0x20] sm:$0xff] %vm316_vm4, %v1994_v13 }
 0x234   : > { %v2215_v29 = vpop.f32.mrf.mxu3 }
 0x235   : > { %v2233_v55 = vadd.f32 %v2215_v29, %v2154_v33  ;;  %v2449_v3 = vpop.f32.mrf.mxu0  ;;  %v1742_v6 = vpop.f32.mrf.mxu1 }
 0x236   : > { %v2471_v20 = vadd.f32 %v2449_v3, %v2392_v47  ;;  %v1756_v27 = vadd.f32 %v1742_v6, %v1677_v43 }
 0x237   : > { %2241 = vst.msk [vmem:[#allocation2 + $0x18] sm:$0xff] %vm316_vm4, %v2233_v55 }
 0x238   : > { %2479 = vst.msk [vmem:[#allocation2 + $0x8] sm:$0xff] %vm316_vm4, %v2471_v20 }
 0x239   : > { %1764 = vst.msk [vmem:[#allocation2 + $0x28] sm:$0xff] %vm316_vm4, %v1756_v27  ;;  %v2155_v58 = vld [vmem:[#allocation2 + $0x20] sm:$0xff] }
 0x23e   : > { %v2394_v54 = vld [vmem:[#allocation2 + $0x18] sm:$0xff] }
 0x23f   : > { %v2487_v4 = vld [vmem:[#allocation2 + $0x8] sm:$0xff] }
 0x240   : > { %2495 = vst.msk [vmem:[%s4325_s23 + $0x8] sm:$0xff] %vm316_vm4, %v2487_v4  ;;  %v1916_v45 = vld [vmem:[#allocation2 + $0x28] sm:$0xff] }
 0x244   : > { %v1981_v8 = vpop.f32.mrf.mxu2 }
 0x245   : > { %v1995_v21 = vadd.f32 %v1981_v8, %v1916_v45 }
 0x246   : > { %v2452_v9 = vpop.f32.mrf.mxu0 }
 0x247   : > { %2003 = vst.msk [vmem:[#allocation2 + $0x28] sm:$0xff] %vm316_vm4, %v1995_v21  ;;  %v2472_v17 = vadd.f32 %v2452_v9, %v2393_v11 }
 0x249   : > { %2480 = vst.msk [vmem:[#allocation2 + $0x10] sm:$0xff] %vm316_vm4, %v2472_v17 }
 0x24a   : > { %v2218_v38 = vpop.f32.mrf.mxu3 }
 0x24b   : > { %v2234_v34 = vadd.f32 %v2218_v38, %v2155_v58 }
 0x24d   : > { %2242 = vst.msk [vmem:[#allocation2 + $0x20] sm:$0xff] %vm316_vm4, %v2234_v34 }
 0x24e   : > { %v1745_v39 = vpop.f32.mrf.mxu1  ;;  %v2156_v51 = vld [vmem:[#allocation2 + $0x28] sm:$0xff] }
 0x24f   : > { %v1757_v37 = vadd.f32 %v1745_v39, %v1678_v10 }
 0x250   : > { %v2488_v5 = vld [vmem:[#allocation2 + $0x10] sm:$0xff] }
 0x251   : > { %2496 = vst.msk [vmem:[%s4325_s23 + $0x10] sm:$0xff] %vm316_vm4, %v2488_v5 }
 0x252   : > { %1765 = vst.msk [vmem:[#allocation2 + $0x30] sm:$0xff] %vm316_vm4, %v1757_v37 }
 0x254   : > { %v2395_v23 = vld [vmem:[#allocation2 + $0x20] sm:$0xff] }
 0x259   : > { %v1917_v12 = vld [vmem:[#allocation2 + $0x30] sm:$0xff] }
 0x25b   : > { %v1984_v24 = vpop.f32.mrf.mxu2 }
 0x25c   : > { %v1996_v35 = vadd.f32 %v1984_v24, %v1917_v12  ;;  %v2455_v28 = vpop.f32.mrf.mxu0 }
 0x25d   : > { %v2473_v36 = vadd.f32 %v2455_v28, %v2394_v54 }
 0x25e   : > { %2004 = vst.msk [vmem:[#allocation2 + $0x30] sm:$0xff] %vm316_vm4, %v1996_v35 }
 0x25f   : > { %2481 = vst.msk [vmem:[#allocation2 + $0x18] sm:$0xff] %vm316_vm4, %v2473_v36 }
 0x263   : > { %v2221_v31 = vpop.f32.mrf.mxu3 }
 0x264   : > { %v2235_v7 = vadd.f32 %v2221_v31, %v2156_v51 }
 0x265   : > { %v1748_v52 = vpop.f32.mrf.mxu1  ;;  %v2157_v41 = vld [vmem:[#allocation2 + $0x30] sm:$0xff] }
 0x266   : > { %v2489_v2 = vld [vmem:[#allocation2 + $0x18] sm:$0xff]  ;;  %2243 = vst.msk [vmem:[#allocation2 + $0x28] sm:$0xff] %vm316_vm4, %v2235_v7  ;;  %v1758_v0 = vadd.f32 %v1748_v52, %v1679_v46 }
 0x267   : > { %2497 = vst.msk [vmem:[%s4325_s23 + $0x18] sm:$0xff] %vm316_vm4, %v2489_v2 }
 0x268   : > { %1766 = vst.msk [vmem:[#allocation2 + $0x38] sm:$0xff] %vm316_vm4, %v1758_v0 }
 0x26b   : > { %v1987_v25 = vpop.f32.mrf.mxu2 }
 0x26d   : > { %v2396_v57 = vld [vmem:[#allocation2 + $0x28] sm:$0xff] }
 0x26f   : > { %v1918_v15 = vld [vmem:[#allocation2 + $0x38] sm:$0xff] }
 0x270   : > { %v1997_v49 = vadd.f32 %v1987_v25, %v1918_v15 }
 0x272   : > { %2005 = vst.msk [vmem:[#allocation2 + $0x38] sm:$0xff] %vm316_vm4, %v1997_v49 }
 0x274   : > { %v2224_v26 = vpop.f32.mrf.mxu3 }
 0x275   : > { %v2236_v63 = vadd.f32 %v2224_v26, %v2157_v41  ;;  %v2458_v62 = vpop.f32.mrf.mxu0 }
 0x276   : > { %v2474_v50 = vadd.f32 %v2458_v62, %v2395_v23 }
 0x277   : > { %2244 = vst.msk [vmem:[#allocation2 + $0x30] sm:$0xff] %vm316_vm4, %v2236_v63 }
 0x278   : > { %2482 = vst.msk [vmem:[#allocation2 + $0x20] sm:$0xff] %vm316_vm4, %v2474_v50 }
 0x279   : > { %v2158_v18 = vld [vmem:[#allocation2 + $0x38] sm:$0xff] }
 0x27d   : > { %v2461_v14 = vpop.f32.mrf.mxu0 }
 0x27e   : > { %v2475_v22 = vadd.f32 %v2461_v14, %v2396_v57  ;;  %v2397_v42 = vld [vmem:[#allocation2 + $0x30] sm:$0xff] }
 0x27f   : > { %v2490_v61 = vld [vmem:[#allocation2 + $0x20] sm:$0xff] }
 0x280   : > { %2498 = vst.msk [vmem:[%s4325_s23 + $0x20] sm:$0xff] %vm316_vm4, %v2490_v61 }
 0x281   : > { %2483 = vst.msk [vmem:[#allocation2 + $0x28] sm:$0xff] %vm316_vm4, %v2475_v22 }
 0x283   : > { %v2227_v40 = vpop.f32.mrf.mxu3 }
 0x284   : > { %v2237_v16 = vadd.f32 %v2227_v40, %v2158_v18 }
 0x285   : > { %v2464_v53 = vpop.f32.mrf.mxu0 }
 0x286   : > { %2245 = vst.msk [vmem:[#allocation2 + $0x38] sm:$0xff] %vm316_vm4, %v2237_v16  ;;  %v2476_v44 = vadd.f32 %v2464_v53, %v2397_v42 }
 0x288   : > { %v2491_v1 = vld [vmem:[#allocation2 + $0x28] sm:$0xff]  ;;  %2484 = vst.msk [vmem:[#allocation2 + $0x30] sm:$0xff] %vm316_vm4, %v2476_v44 }
 0x289   : > { %2499 = vst.msk [vmem:[%s4325_s23 + $0x28] sm:$0xff] %vm316_vm4, %v2491_v1 }
 0x28d   : > { %v2398_v60 = vld [vmem:[#allocation2 + $0x38] sm:$0xff]  ;;  %v2467_v32 = vpop.f32.mrf.mxu0 }
 0x28e   : > { %v2477_v19 = vadd.f32 %v2467_v32, %v2398_v60 }
 0x28f   : > { %v2492_v48 = vld [vmem:[#allocation2 + $0x30] sm:$0xff] }
 0x290   : > { %2500 = vst.msk [vmem:[%s4325_s23 + $0x30] sm:$0xff] %vm316_vm4, %v2492_v48 }
 0x291   : > { %2485 = vst.msk [vmem:[#allocation2 + $0x38] sm:$0xff] %vm316_vm4, %v2477_v19 }
 0x298   : > { %v2493_v59 = vld [vmem:[#allocation2 + $0x38] sm:$0xff] }
 0x299   : > { %2501 = vst.msk [vmem:[%s4325_s23 + $0x38] sm:$0xff] %vm316_vm4, %v2493_v59 }
 0x29a PF: > { %s14_s19 = sadd.s32 1, %s2948_s19   ;;  %s4384_s15 = smov %s2940_s17 }
 0x29b   : > { %p11_p10 = scmp.ge.s32.totalorder %s14_s19, 18   ;;  %s4385_s16 = smov %s2944_s18 }
 0x29c   : > { %s4386_s17 = smov %s4389_s20  ;;  %s4387_s18 = smov %s4393_s21 }
 0x29d   :  { %13 = sbr.rel (!%p11_p10) target bundleno = 3 (0x3), region = 86 }

</bundles_post_ra>
